<compile_context>
chip_gen: v7x
topology: tpu7x:2x2x1
jax: 0.10.0
libtpu: 0.0.40
codegen_flags: <defaults>
</compile_context>

<pallas_src>
import functools

import jax
import jax.numpy as jnp
from jax.experimental import pallas as pl
from jax.experimental.pallas import tpu as pltpu


# --------------------------------------------------------------------------------------
# Pallas kernel: full stacked LSTM encoder in one invocation (no grid).
# --------------------------------------------------------------------------------------
def _encoder_kernel(n_layers, T, B, H, lens_ref, x_ref, *rest):
    layer_refs = rest[:3 * n_layers]          # per layer: W_ih^T, W_hh^T, bias
    ht_ref = rest[3 * n_layers]               # (B, H) output
    gates_sc, seq_sc, h_sc, c_sc = rest[3 * n_layers + 1:]

    lens = lens_ref[...]                      # (B, 1) int32 valid lengths

    for layer in range(n_layers):
        w_ih_t = layer_refs[3 * layer][...]       # (in_dim, 4H)
        w_hh_t = layer_refs[3 * layer + 1][...]   # (H, 4H)
        bias = layer_refs[3 * layer + 2][...]     # (1, 4H)  (b_ih + b_hh, reordered)
        last_layer = (layer == n_layers - 1)

        # Input sequence for this layer, flattened over time: (T*B, in_dim).
        if layer == 0:
            seq_in = x_ref[...]
        else:
            seq_in = seq_sc[...].reshape(T * B, H)

        # Time-parallel input projection: one big MXU matmul, bias folded in.
        gates_sc[...] = (
            jnp.dot(seq_in, w_ih_t, preferred_element_type=jnp.float32) + bias
        ).reshape(T, B, 4 * H)

        h_sc[...] = jnp.zeros((B, H), jnp.float32)
        c_sc[...] = jnp.zeros((B, H), jnp.float32)

        def step(t, carry, w_hh_t=w_hh_t, last_layer=last_layer):
            h = h_sc[...]
            c = c_sc[...]
            # Only the recurrent matmul sits on the serial critical path.
            g = gates_sc[t] + jnp.dot(h, w_hh_t, preferred_element_type=jnp.float32)
            # Gate order (host-reordered): [i, f, o, g]
            sig = jax.nn.sigmoid(g[:, : 3 * H])
            i_g = sig[:, 0 * H:1 * H]
            f_g = sig[:, 1 * H:2 * H]
            o_g = sig[:, 2 * H:3 * H]
            g_g = jnp.tanh(g[:, 3 * H:])
            c_new = f_g * c + i_g * g_g
            h_new = o_g * jnp.tanh(c_new)
            # Packed-sequence semantics: freeze state once t >= length[b].
            valid = lens > t
            h_next = jnp.where(valid, h_new, h)
            c_next = jnp.where(valid, c_new, c)
            h_sc[...] = h_next
            c_sc[...] = c_next
            if not last_layer:
                seq_sc[t] = h_next        # per-step output feeds the next layer
            return carry

        jax.lax.fori_loop(0, T, step, 0, unroll=True)

    ht_ref[...] = h_sc[...]


# --------------------------------------------------------------------------------------
# Wrapper: host-side weight prep (reorder gates, transpose, fold biases) + pallas_call.
# --------------------------------------------------------------------------------------
def encoder_forward(x, lens, params):
    """x: (T, B, E) f32; lens: (B, 1) int32; params: list of (w_ih (4H,E/H), w_hh (4H,H),
    bias (1,4H)) in PyTorch gate order [i, f, g, o].  Returns ht[-1]: (B, H)."""
    T, B, E = x.shape
    H = params[0][1].shape[1]
    n_layers = len(params)

    def reorder_rows(w):  # [i, f, g, o] rows -> [i, f, o, g]
        return jnp.concatenate(
            [w[0:H], w[H:2 * H], w[3 * H:4 * H], w[2 * H:3 * H]], axis=0)

    prepped = []
    for (w_ih, w_hh, b) in params:
        b_flat = b.reshape(4 * H)
        b_r = jnp.concatenate(
            [b_flat[0:H], b_flat[H:2 * H], b_flat[3 * H:4 * H], b_flat[2 * H:3 * H]]
        ).reshape(1, 4 * H)
        prepped.extend([reorder_rows(w_ih).T, reorder_rows(w_hh).T, b_r])

    x2d = x.reshape(T * B, E)
    kernel = functools.partial(_encoder_kernel, n_layers, T, B, H)

    ht = pl.pallas_call(
        kernel,
        out_shape=jax.ShapeDtypeStruct((B, H), jnp.float32),
        scratch_shapes=[
            pltpu.VMEM((T, B, 4 * H), jnp.float32),   # precomputed input-projection gates
            pltpu.VMEM((T, B, H), jnp.float32),       # per-step outputs (layer l -> l+1)
            pltpu.VMEM((B, H), jnp.float32),          # h carry
            pltpu.VMEM((B, H), jnp.float32),          # c carry
        ],
    )(lens, x2d, *prepped)
    return ht


# --------------------------------------------------------------------------------------
# Pure-JAX reference (PyTorch gate order), for correctness check.
# --------------------------------------------------------------------------------------
def encoder_reference(x, lens, params):
    T, B, _ = x.shape
    seq = x
    ht = None
    for (w_ih, w_hh, b) in params:
        H = w_hh.shape[1]
        h = jnp.zeros((B, H), jnp.float32)
        c = jnp.zeros((B, H), jnp.float32)
        outs = []
        for t in range(T):
            gates = seq[t] @ w_ih.T + h @ w_hh.T + b
            i_g = jax.nn.sigmoid(gates[:, 0 * H:1 * H])
            f_g = jax.nn.sigmoid(gates[:, 1 * H:2 * H])
            g_g = jnp.tanh(gates[:, 2 * H:3 * H])
            o_g = jax.nn.sigmoid(gates[:, 3 * H:4 * H])
            c_new = f_g * c + i_g * g_g
            h_new = o_g * jnp.tanh(c_new)
            valid = lens > t
            h = jnp.where(valid, h_new, h)
            c = jnp.where(valid, c_new, c)
            outs.append(h)
        seq = jnp.stack(outs, axis=0)
        ht = h
    return ht


# --------------------------------------------------------------------------------------
# Main
# --------------------------------------------------------------------------------------
if __name__ == "__main__":
    # Small config consistent with the module: d_embed=32, d_hidden=32, n_layers=2,
    # dp_ratio=0.0, birnn=False -> n_cells=2, ht[-1] has shape (batch, d_hidden).
    D_EMBED = 32
    D_HIDDEN = 32
    N_LAYERS = 2
    T = 6    # max sequence length
    B = 8    # batch (== inputs.batch_sizes[0])

    key = jax.random.PRNGKey(0)

    # PyTorch LSTM default init: U(-1/sqrt(H), 1/sqrt(H)), gate order [i, f, g, o].
    bound = 1.0 / (D_HIDDEN ** 0.5)
    params = []
    for layer in range(N_LAYERS):
        in_size = D_EMBED if layer == 0 else D_HIDDEN
        key, k1, k2, k3, k4 = jax.random.split(key, 5)
        w_ih = jax.random.uniform(k1, (4 * D_HIDDEN, in_size), jnp.float32, -bound, bound)
        w_hh = jax.random.uniform(k2, (4 * D_HIDDEN, D_HIDDEN), jnp.float32, -bound, bound)
        b_ih = jax.random.uniform(k3, (4 * D_HIDDEN,), jnp.float32, -bound, bound)
        b_hh = jax.random.uniform(k4, (4 * D_HIDDEN,), jnp.float32, -bound, bound)
        params.append((w_ih, w_hh, (b_ih + b_hh).reshape(1, 4 * D_HIDDEN)))

    # Example "packed sequence": time-major padded tensor + descending valid lengths.
    key, kx, kl = jax.random.split(key, 3)
    x = jax.random.normal(kx, (T, B, D_EMBED), jnp.float32)
    lens_flat = jnp.sort(
        jax.random.randint(kl, (B,), 1, T + 1), descending=True).astype(jnp.int32)
    lens = lens_flat.reshape(B, 1)
    # zero the padded timesteps (as an unpacked PackedSequence would imply)
    t_idx = jnp.arange(T).reshape(T, 1, 1)
    x = x * (t_idx < lens_flat.reshape(1, B, 1)).astype(jnp.float32)

    ht = encoder_forward(x, lens, params)
    ht = jax.block_until_ready(ht)

    ht_ref = encoder_reference(x, lens, params)
    assert ht.shape == (B, D_HIDDEN)
    if not jnp.allclose(ht, ht_ref, atol=1e-3, rtol=1e-3):
        raise AssertionError("Pallas LSTM encoder mismatch vs reference")

    print("KERNEL_OK")
</pallas_src>

<mosaic_0001>
module attributes {stable_mosaic.version = 11 : i64} {
  func.func @_encoder_kernel(%arg0: memref<8x1xi32, #tpu.memory_space<vmem>>, %arg1: memref<48x32xf32, #tpu.memory_space<vmem>>, %arg2: memref<32x128xf32, #tpu.memory_space<vmem>>, %arg3: memref<32x128xf32, #tpu.memory_space<vmem>>, %arg4: memref<1x128xf32, #tpu.memory_space<vmem>>, %arg5: memref<32x128xf32, #tpu.memory_space<vmem>>, %arg6: memref<32x128xf32, #tpu.memory_space<vmem>>, %arg7: memref<1x128xf32, #tpu.memory_space<vmem>>, %arg8: memref<8x32xf32, #tpu.memory_space<vmem>>, %arg9: memref<6x8x128xf32, #tpu.memory_space<vmem>>, %arg10: memref<6x8x32xf32, #tpu.memory_space<vmem>>, %arg11: memref<8x32xf32, #tpu.memory_space<vmem>>, %arg12: memref<8x32xf32, #tpu.memory_space<vmem>>) attributes {dimension_semantics = [], scalar_prefetch = 0 : i64, scratch_operands = 4 : i64, tpu.core_type = #tpu.core_type<tc>} {
    %c0 = arith.constant 0 : index
    %c0_0 = arith.constant 0 : index
    %0 = vector.load %arg0[%c0, %c0_0] : memref<8x1xi32, #tpu.memory_space<vmem>>, vector<8x1xi32>
    %c0_1 = arith.constant 0 : index
    %c0_2 = arith.constant 0 : index
    %1 = vector.load %arg2[%c0_1, %c0_2] : memref<32x128xf32, #tpu.memory_space<vmem>>, vector<32x128xf32>
    %c0_3 = arith.constant 0 : index
    %c0_4 = arith.constant 0 : index
    %2 = vector.load %arg3[%c0_3, %c0_4] : memref<32x128xf32, #tpu.memory_space<vmem>>, vector<32x128xf32>
    %c0_5 = arith.constant 0 : index
    %c0_6 = arith.constant 0 : index
    %3 = vector.load %arg4[%c0_5, %c0_6] : memref<1x128xf32, #tpu.memory_space<vmem>>, vector<1x128xf32>
    %c0_7 = arith.constant 0 : index
    %c0_8 = arith.constant 0 : index
    %4 = vector.load %arg1[%c0_7, %c0_8] : memref<48x32xf32, #tpu.memory_space<vmem>>, vector<48x32xf32>
    %cst = arith.constant dense<0.000000e+00> : vector<48x128xf32>
    %5 = tpu.matmul %4, %1, %cst {dimension_numbers = #tpu.dot_dimension_numbers<[1], [0], [0], [1], [0, 0, 1, 1], [], []>} : vector<48x32xf32>, vector<32x128xf32>, vector<48x128xf32> -> vector<48x128xf32>
    %6 = vector.broadcast %3 : vector<1x128xf32> to vector<48x128xf32>
    %7 = arith.addf %5, %6 : vector<48x128xf32>
    %8 = vector.shape_cast %7 : vector<48x128xf32> to vector<6x8x128xf32>
    %c0_9 = arith.constant 0 : index
    %c0_10 = arith.constant 0 : index
    %c0_11 = arith.constant 0 : index
    %9 = vector.load %arg9[%c0_9, %c0_10, %c0_11] : memref<6x8x128xf32, #tpu.memory_space<vmem>>, vector<6x8x128xf32>
    tpu.vector_store %arg9[%c0_9, %c0_10, %c0_11], %8 {strides = array<i32>} : memref<6x8x128xf32, #tpu.memory_space<vmem>>, vector<6x8x128xf32>,
    %cst_12 = arith.constant 0.000000e+00 : f32
    %10 = vector.broadcast %cst_12 : f32 to vector<8x32xf32>
    %c0_13 = arith.constant 0 : index
    %c0_14 = arith.constant 0 : index
    %11 = vector.load %arg11[%c0_13, %c0_14] : memref<8x32xf32, #tpu.memory_space<vmem>>, vector<8x32xf32>
    tpu.vector_store %arg11[%c0_13, %c0_14], %10 {strides = array<i32>} : memref<8x32xf32, #tpu.memory_space<vmem>>, vector<8x32xf32>,
    %cst_15 = arith.constant 0.000000e+00 : f32
    %12 = vector.broadcast %cst_15 : f32 to vector<8x32xf32>
    %c0_16 = arith.constant 0 : index
    %c0_17 = arith.constant 0 : index
    %13 = vector.load %arg12[%c0_16, %c0_17] : memref<8x32xf32, #tpu.memory_space<vmem>>, vector<8x32xf32>
    tpu.vector_store %arg12[%c0_16, %c0_17], %12 {strides = array<i32>} : memref<8x32xf32, #tpu.memory_space<vmem>>, vector<8x32xf32>,
    %c0_i32 = arith.constant 0 : i32
    %c0_18 = arith.constant 0 : index
    %c0_19 = arith.constant 0 : index
    %14 = vector.load %arg11[%c0_18, %c0_19] : memref<8x32xf32, #tpu.memory_space<vmem>>, vector<8x32xf32>
    %c0_20 = arith.constant 0 : index
    %c0_21 = arith.constant 0 : index
    %15 = vector.load %arg12[%c0_20, %c0_21] : memref<8x32xf32, #tpu.memory_space<vmem>>, vector<8x32xf32>
    %16 = arith.index_cast %c0_i32 : i32 to index
    %c0_22 = arith.constant 0 : index
    %c0_23 = arith.constant 0 : index
    %17 = vector.load %arg9[%16, %c0_22, %c0_23] : memref<6x8x128xf32, #tpu.memory_space<vmem>>, vector<1x8x128xf32>
    %18 = vector.shape_cast %17 : vector<1x8x128xf32> to vector<8x128xf32>
    %cst_24 = arith.constant dense<0.000000e+00> : vector<8x128xf32>
    %19 = tpu.matmul %14, %2, %cst_24 {dimension_numbers = #tpu.dot_dimension_numbers<[1], [0], [0], [1], [0, 0, 1, 1], [], []>} : vector<8x32xf32>, vector<32x128xf32>, vector<8x128xf32> -> vector<8x128xf32>
    %20 = arith.addf %18, %19 : vector<8x128xf32>
    %21 = vector.extract_strided_slice %20 {offsets = [0, 0], sizes = [8, 96], strides = [1, 1]} : vector<8x128xf32> to vector<8x96xf32>
    %22 = arith.negf %21 : vector<8x96xf32>
    %23 = math.exp %22 : vector<8x96xf32>
    %cst_25 = arith.constant 1.000000e+00 : f32
    %24 = vector.broadcast %cst_25 : f32 to vector<8x96xf32>
    %25 = arith.addf %24, %23 : vector<8x96xf32>
    %26 = arith.divf %24, %25 : vector<8x96xf32>
    %27 = vector.extract_strided_slice %26 {offsets = [0, 0], sizes = [8, 32], strides = [1, 1]} : vector<8x96xf32> to vector<8x32xf32>
    %28 = vector.extract_strided_slice %26 {offsets = [0, 32], sizes = [8, 32], strides = [1, 1]} : vector<8x96xf32> to vector<8x32xf32>
    %29 = vector.extract_strided_slice %26 {offsets = [0, 64], sizes = [8, 32], strides = [1, 1]} : vector<8x96xf32> to vector<8x32xf32>
    %30 = vector.extract_strided_slice %20 {offsets = [0, 96], sizes = [8, 32], strides = [1, 1]} : vector<8x128xf32> to vector<8x32xf32>
    %31 = math.tanh %30 : vector<8x32xf32>
    %32 = arith.mulf %28, %15 : vector<8x32xf32>
    %33 = arith.mulf %27, %31 : vector<8x32xf32>
    %34 = arith.addf %32, %33 : vector<8x32xf32>
    %35 = math.tanh %34 : vector<8x32xf32>
    %36 = arith.mulf %29, %35 : vector<8x32xf32>
    %37 = vector.broadcast %c0_i32 : i32 to vector<8x1xi32>
    %38 = arith.cmpi sgt, %0, %37 : vector<8x1xi32>
    %39 = vector.shape_cast %38 : vector<8x1xi1> to vector<8x1xi1>
    %40 = vector.broadcast %39 : vector<8x1xi1> to vector<8x32xi1>
    %41 = arith.select %40, %36, %14 : vector<8x32xi1>, vector<8x32xf32>
    %42 = vector.shape_cast %38 : vector<8x1xi1> to vector<8x1xi1>
    %43 = vector.broadcast %42 : vector<8x1xi1> to vector<8x32xi1>
    %44 = arith.select %43, %34, %15 : vector<8x32xi1>, vector<8x32xf32>
    %c0_26 = arith.constant 0 : index
    %c0_27 = arith.constant 0 : index
    %45 = vector.load %arg11[%c0_26, %c0_27] : memref<8x32xf32, #tpu.memory_space<vmem>>, vector<8x32xf32>
    tpu.vector_store %arg11[%c0_26, %c0_27], %41 {strides = array<i32>} : memref<8x32xf32, #tpu.memory_space<vmem>>, vector<8x32xf32>,
    %c0_28 = arith.constant 0 : index
    %c0_29 = arith.constant 0 : index
    %46 = vector.load %arg12[%c0_28, %c0_29] : memref<8x32xf32, #tpu.memory_space<vmem>>, vector<8x32xf32>
    tpu.vector_store %arg12[%c0_28, %c0_29], %44 {strides = array<i32>} : memref<8x32xf32, #tpu.memory_space<vmem>>, vector<8x32xf32>,
    %47 = arith.index_cast %c0_i32 : i32 to index
    %c0_30 = arith.constant 0 : index
    %c0_31 = arith.constant 0 : index
    %48 = vector.load %arg10[%47, %c0_30, %c0_31] : memref<6x8x32xf32, #tpu.memory_space<vmem>>, vector<1x8x32xf32>
    %49 = vector.shape_cast %48 : vector<1x8x32xf32> to vector<8x32xf32>
    %50 = vector.shape_cast %41 : vector<8x32xf32> to vector<1x8x32xf32>
    tpu.vector_store %arg10[%47, %c0_30, %c0_31], %50 {strides = array<i32>} : memref<6x8x32xf32, #tpu.memory_space<vmem>>, vector<1x8x32xf32>,
    %c1_i32 = arith.constant 1 : i32
    %c0_32 = arith.constant 0 : index
    %c0_33 = arith.constant 0 : index
    %51 = vector.load %arg11[%c0_32, %c0_33] : memref<8x32xf32, #tpu.memory_space<vmem>>, vector<8x32xf32>
    %c0_34 = arith.constant 0 : index
    %c0_35 = arith.constant 0 : index
    %52 = vector.load %arg12[%c0_34, %c0_35] : memref<8x32xf32, #tpu.memory_space<vmem>>, vector<8x32xf32>
    %53 = arith.index_cast %c1_i32 : i32 to index
    %c0_36 = arith.constant 0 : index
    %c0_37 = arith.constant 0 : index
    %54 = vector.load %arg9[%53, %c0_36, %c0_37] : memref<6x8x128xf32, #tpu.memory_space<vmem>>, vector<1x8x128xf32>
    %55 = vector.shape_cast %54 : vector<1x8x128xf32> to vector<8x128xf32>
    %cst_38 = arith.constant dense<0.000000e+00> : vector<8x128xf32>
    %56 = tpu.matmul %51, %2, %cst_38 {dimension_numbers = #tpu.dot_dimension_numbers<[1], [0], [0], [1], [0, 0, 1, 1], [], []>} : vector<8x32xf32>, vector<32x128xf32>, vector<8x128xf32> -> vector<8x128xf32>
    %57 = arith.addf %55, %56 : vector<8x128xf32>
    %58 = vector.extract_strided_slice %57 {offsets = [0, 0], sizes = [8, 96], strides = [1, 1]} : vector<8x128xf32> to vector<8x96xf32>
    %59 = arith.negf %58 : vector<8x96xf32>
    %60 = math.exp %59 : vector<8x96xf32>
    %cst_39 = arith.constant 1.000000e+00 : f32
    %61 = vector.broadcast %cst_39 : f32 to vector<8x96xf32>
    %62 = arith.addf %61, %60 : vector<8x96xf32>
    %63 = arith.divf %61, %62 : vector<8x96xf32>
    %64 = vector.extract_strided_slice %63 {offsets = [0, 0], sizes = [8, 32], strides = [1, 1]} : vector<8x96xf32> to vector<8x32xf32>
    %65 = vector.extract_strided_slice %63 {offsets = [0, 32], sizes = [8, 32], strides = [1, 1]} : vector<8x96xf32> to vector<8x32xf32>
    %66 = vector.extract_strided_slice %63 {offsets = [0, 64], sizes = [8, 32], strides = [1, 1]} : vector<8x96xf32> to vector<8x32xf32>
    %67 = vector.extract_strided_slice %57 {offsets = [0, 96], sizes = [8, 32], strides = [1, 1]} : vector<8x128xf32> to vector<8x32xf32>
    %68 = math.tanh %67 : vector<8x32xf32>
    %69 = arith.mulf %65, %52 : vector<8x32xf32>
    %70 = arith.mulf %64, %68 : vector<8x32xf32>
    %71 = arith.addf %69, %70 : vector<8x32xf32>
    %72 = math.tanh %71 : vector<8x32xf32>
    %73 = arith.mulf %66, %72 : vector<8x32xf32>
    %74 = vector.broadcast %c1_i32 : i32 to vector<8x1xi32>
    %75 = arith.cmpi sgt, %0, %74 : vector<8x1xi32>
    %76 = vector.shape_cast %75 : vector<8x1xi1> to vector<8x1xi1>
    %77 = vector.broadcast %76 : vector<8x1xi1> to vector<8x32xi1>
    %78 = arith.select %77, %73, %51 : vector<8x32xi1>, vector<8x32xf32>
    %79 = vector.shape_cast %75 : vector<8x1xi1> to vector<8x1xi1>
    %80 = vector.broadcast %79 : vector<8x1xi1> to vector<8x32xi1>
    %81 = arith.select %80, %71, %52 : vector<8x32xi1>, vector<8x32xf32>
    %c0_40 = arith.constant 0 : index
    %c0_41 = arith.constant 0 : index
    %82 = vector.load %arg11[%c0_40, %c0_41] : memref<8x32xf32, #tpu.memory_space<vmem>>, vector<8x32xf32>
    tpu.vector_store %arg11[%c0_40, %c0_41], %78 {strides = array<i32>} : memref<8x32xf32, #tpu.memory_space<vmem>>, vector<8x32xf32>,
    %c0_42 = arith.constant 0 : index
    %c0_43 = arith.constant 0 : index
    %83 = vector.load %arg12[%c0_42, %c0_43] : memref<8x32xf32, #tpu.memory_space<vmem>>, vector<8x32xf32>
    tpu.vector_store %arg12[%c0_42, %c0_43], %81 {strides = array<i32>} : memref<8x32xf32, #tpu.memory_space<vmem>>, vector<8x32xf32>,
    %84 = arith.index_cast %c1_i32 : i32 to index
    %c0_44 = arith.constant 0 : index
    %c0_45 = arith.constant 0 : index
    %85 = vector.load %arg10[%84, %c0_44, %c0_45] : memref<6x8x32xf32, #tpu.memory_space<vmem>>, vector<1x8x32xf32>
    %86 = vector.shape_cast %85 : vector<1x8x32xf32> to vector<8x32xf32>
    %87 = vector.shape_cast %78 : vector<8x32xf32> to vector<1x8x32xf32>
    tpu.vector_store %arg10[%84, %c0_44, %c0_45], %87 {strides = array<i32>} : memref<6x8x32xf32, #tpu.memory_space<vmem>>, vector<1x8x32xf32>,
    %c2_i32 = arith.constant 2 : i32
    %c0_46 = arith.constant 0 : index
    %c0_47 = arith.constant 0 : index
    %88 = vector.load %arg11[%c0_46, %c0_47] : memref<8x32xf32, #tpu.memory_space<vmem>>, vector<8x32xf32>
    %c0_48 = arith.constant 0 : index
    %c0_49 = arith.constant 0 : index
    %89 = vector.load %arg12[%c0_48, %c0_49] : memref<8x32xf32, #tpu.memory_space<vmem>>, vector<8x32xf32>
    %90 = arith.index_cast %c2_i32 : i32 to index
    %c0_50 = arith.constant 0 : index
    %c0_51 = arith.constant 0 : index
    %91 = vector.load %arg9[%90, %c0_50, %c0_51] : memref<6x8x128xf32, #tpu.memory_space<vmem>>, vector<1x8x128xf32>
    %92 = vector.shape_cast %91 : vector<1x8x128xf32> to vector<8x128xf32>
    %cst_52 = arith.constant dense<0.000000e+00> : vector<8x128xf32>
    %93 = tpu.matmul %88, %2, %cst_52 {dimension_numbers = #tpu.dot_dimension_numbers<[1], [0], [0], [1], [0, 0, 1, 1], [], []>} : vector<8x32xf32>, vector<32x128xf32>, vector<8x128xf32> -> vector<8x128xf32>
    %94 = arith.addf %92, %93 : vector<8x128xf32>
    %95 = vector.extract_strided_slice %94 {offsets = [0, 0], sizes = [8, 96], strides = [1, 1]} : vector<8x128xf32> to vector<8x96xf32>
    %96 = arith.negf %95 : vector<8x96xf32>
    %97 = math.exp %96 : vector<8x96xf32>
    %cst_53 = arith.constant 1.000000e+00 : f32
    %98 = vector.broadcast %cst_53 : f32 to vector<8x96xf32>
    %99 = arith.addf %98, %97 : vector<8x96xf32>
    %100 = arith.divf %98, %99 : vector<8x96xf32>
    %101 = vector.extract_strided_slice %100 {offsets = [0, 0], sizes = [8, 32], strides = [1, 1]} : vector<8x96xf32> to vector<8x32xf32>
    %102 = vector.extract_strided_slice %100 {offsets = [0, 32], sizes = [8, 32], strides = [1, 1]} : vector<8x96xf32> to vector<8x32xf32>
    %103 = vector.extract_strided_slice %100 {offsets = [0, 64], sizes = [8, 32], strides = [1, 1]} : vector<8x96xf32> to vector<8x32xf32>
    %104 = vector.extract_strided_slice %94 {offsets = [0, 96], sizes = [8, 32], strides = [1, 1]} : vector<8x128xf32> to vector<8x32xf32>
    %105 = math.tanh %104 : vector<8x32xf32>
    %106 = arith.mulf %102, %89 : vector<8x32xf32>
    %107 = arith.mulf %101, %105 : vector<8x32xf32>
    %108 = arith.addf %106, %107 : vector<8x32xf32>
    %109 = math.tanh %108 : vector<8x32xf32>
    %110 = arith.mulf %103, %109 : vector<8x32xf32>
    %111 = vector.broadcast %c2_i32 : i32 to vector<8x1xi32>
    %112 = arith.cmpi sgt, %0, %111 : vector<8x1xi32>
    %113 = vector.shape_cast %112 : vector<8x1xi1> to vector<8x1xi1>
    %114 = vector.broadcast %113 : vector<8x1xi1> to vector<8x32xi1>
    %115 = arith.select %114, %110, %88 : vector<8x32xi1>, vector<8x32xf32>
    %116 = vector.shape_cast %112 : vector<8x1xi1> to vector<8x1xi1>
    %117 = vector.broadcast %116 : vector<8x1xi1> to vector<8x32xi1>
    %118 = arith.select %117, %108, %89 : vector<8x32xi1>, vector<8x32xf32>
    %c0_54 = arith.constant 0 : index
    %c0_55 = arith.constant 0 : index
    %119 = vector.load %arg11[%c0_54, %c0_55] : memref<8x32xf32, #tpu.memory_space<vmem>>, vector<8x32xf32>
    tpu.vector_store %arg11[%c0_54, %c0_55], %115 {strides = array<i32>} : memref<8x32xf32, #tpu.memory_space<vmem>>, vector<8x32xf32>,
    %c0_56 = arith.constant 0 : index
    %c0_57 = arith.constant 0 : index
    %120 = vector.load %arg12[%c0_56, %c0_57] : memref<8x32xf32, #tpu.memory_space<vmem>>, vector<8x32xf32>
    tpu.vector_store %arg12[%c0_56, %c0_57], %118 {strides = array<i32>} : memref<8x32xf32, #tpu.memory_space<vmem>>, vector<8x32xf32>,
    %121 = arith.index_cast %c2_i32 : i32 to index
    %c0_58 = arith.constant 0 : index
    %c0_59 = arith.constant 0 : index
    %122 = vector.load %arg10[%121, %c0_58, %c0_59] : memref<6x8x32xf32, #tpu.memory_space<vmem>>, vector<1x8x32xf32>
    %123 = vector.shape_cast %122 : vector<1x8x32xf32> to vector<8x32xf32>
    %124 = vector.shape_cast %115 : vector<8x32xf32> to vector<1x8x32xf32>
    tpu.vector_store %arg10[%121, %c0_58, %c0_59], %124 {strides = array<i32>} : memref<6x8x32xf32, #tpu.memory_space<vmem>>, vector<1x8x32xf32>,
    %c3_i32 = arith.constant 3 : i32
    %c0_60 = arith.constant 0 : index
    %c0_61 = arith.constant 0 : index
    %125 = vector.load %arg11[%c0_60, %c0_61] : memref<8x32xf32, #tpu.memory_space<vmem>>, vector<8x32xf32>
    %c0_62 = arith.constant 0 : index
    %c0_63 = arith.constant 0 : index
    %126 = vector.load %arg12[%c0_62, %c0_63] : memref<8x32xf32, #tpu.memory_space<vmem>>, vector<8x32xf32>
    %127 = arith.index_cast %c3_i32 : i32 to index
    %c0_64 = arith.constant 0 : index
    %c0_65 = arith.constant 0 : index
    %128 = vector.load %arg9[%127, %c0_64, %c0_65] : memref<6x8x128xf32, #tpu.memory_space<vmem>>, vector<1x8x128xf32>
    %129 = vector.shape_cast %128 : vector<1x8x128xf32> to vector<8x128xf32>
    %cst_66 = arith.constant dense<0.000000e+00> : vector<8x128xf32>
    %130 = tpu.matmul %125, %2, %cst_66 {dimension_numbers = #tpu.dot_dimension_numbers<[1], [0], [0], [1], [0, 0, 1, 1], [], []>} : vector<8x32xf32>, vector<32x128xf32>, vector<8x128xf32> -> vector<8x128xf32>
    %131 = arith.addf %129, %130 : vector<8x128xf32>
    %132 = vector.extract_strided_slice %131 {offsets = [0, 0], sizes = [8, 96], strides = [1, 1]} : vector<8x128xf32> to vector<8x96xf32>
    %133 = arith.negf %132 : vector<8x96xf32>
    %134 = math.exp %133 : vector<8x96xf32>
    %cst_67 = arith.constant 1.000000e+00 : f32
    %135 = vector.broadcast %cst_67 : f32 to vector<8x96xf32>
    %136 = arith.addf %135, %134 : vector<8x96xf32>
    %137 = arith.divf %135, %136 : vector<8x96xf32>
    %138 = vector.extract_strided_slice %137 {offsets = [0, 0], sizes = [8, 32], strides = [1, 1]} : vector<8x96xf32> to vector<8x32xf32>
    %139 = vector.extract_strided_slice %137 {offsets = [0, 32], sizes = [8, 32], strides = [1, 1]} : vector<8x96xf32> to vector<8x32xf32>
    %140 = vector.extract_strided_slice %137 {offsets = [0, 64], sizes = [8, 32], strides = [1, 1]} : vector<8x96xf32> to vector<8x32xf32>
    %141 = vector.extract_strided_slice %131 {offsets = [0, 96], sizes = [8, 32], strides = [1, 1]} : vector<8x128xf32> to vector<8x32xf32>
    %142 = math.tanh %141 : vector<8x32xf32>
    %143 = arith.mulf %139, %126 : vector<8x32xf32>
    %144 = arith.mulf %138, %142 : vector<8x32xf32>
    %145 = arith.addf %143, %144 : vector<8x32xf32>
    %146 = math.tanh %145 : vector<8x32xf32>
    %147 = arith.mulf %140, %146 : vector<8x32xf32>
    %148 = vector.broadcast %c3_i32 : i32 to vector<8x1xi32>
    %149 = arith.cmpi sgt, %0, %148 : vector<8x1xi32>
    %150 = vector.shape_cast %149 : vector<8x1xi1> to vector<8x1xi1>
    %151 = vector.broadcast %150 : vector<8x1xi1> to vector<8x32xi1>
    %152 = arith.select %151, %147, %125 : vector<8x32xi1>, vector<8x32xf32>
    %153 = vector.shape_cast %149 : vector<8x1xi1> to vector<8x1xi1>
    %154 = vector.broadcast %153 : vector<8x1xi1> to vector<8x32xi1>
    %155 = arith.select %154, %145, %126 : vector<8x32xi1>, vector<8x32xf32>
    %c0_68 = arith.constant 0 : index
    %c0_69 = arith.constant 0 : index
    %156 = vector.load %arg11[%c0_68, %c0_69] : memref<8x32xf32, #tpu.memory_space<vmem>>, vector<8x32xf32>
    tpu.vector_store %arg11[%c0_68, %c0_69], %152 {strides = array<i32>} : memref<8x32xf32, #tpu.memory_space<vmem>>, vector<8x32xf32>,
    %c0_70 = arith.constant 0 : index
    %c0_71 = arith.constant 0 : index
    %157 = vector.load %arg12[%c0_70, %c0_71] : memref<8x32xf32, #tpu.memory_space<vmem>>, vector<8x32xf32>
    tpu.vector_store %arg12[%c0_70, %c0_71], %155 {strides = array<i32>} : memref<8x32xf32, #tpu.memory_space<vmem>>, vector<8x32xf32>,
    %158 = arith.index_cast %c3_i32 : i32 to index
    %c0_72 = arith.constant 0 : index
    %c0_73 = arith.constant 0 : index
    %159 = vector.load %arg10[%158, %c0_72, %c0_73] : memref<6x8x32xf32, #tpu.memory_space<vmem>>, vector<1x8x32xf32>
    %160 = vector.shape_cast %159 : vector<1x8x32xf32> to vector<8x32xf32>
    %161 = vector.shape_cast %152 : vector<8x32xf32> to vector<1x8x32xf32>
    tpu.vector_store %arg10[%158, %c0_72, %c0_73], %161 {strides = array<i32>} : memref<6x8x32xf32, #tpu.memory_space<vmem>>, vector<1x8x32xf32>,
    %c4_i32 = arith.constant 4 : i32
    %c0_74 = arith.constant 0 : index
    %c0_75 = arith.constant 0 : index
    %162 = vector.load %arg11[%c0_74, %c0_75] : memref<8x32xf32, #tpu.memory_space<vmem>>, vector<8x32xf32>
    %c0_76 = arith.constant 0 : index
    %c0_77 = arith.constant 0 : index
    %163 = vector.load %arg12[%c0_76, %c0_77] : memref<8x32xf32, #tpu.memory_space<vmem>>, vector<8x32xf32>
    %164 = arith.index_cast %c4_i32 : i32 to index
    %c0_78 = arith.constant 0 : index
    %c0_79 = arith.constant 0 : index
    %165 = vector.load %arg9[%164, %c0_78, %c0_79] : memref<6x8x128xf32, #tpu.memory_space<vmem>>, vector<1x8x128xf32>
    %166 = vector.shape_cast %165 : vector<1x8x128xf32> to vector<8x128xf32>
    %cst_80 = arith.constant dense<0.000000e+00> : vector<8x128xf32>
    %167 = tpu.matmul %162, %2, %cst_80 {dimension_numbers = #tpu.dot_dimension_numbers<[1], [0], [0], [1], [0, 0, 1, 1], [], []>} : vector<8x32xf32>, vector<32x128xf32>, vector<8x128xf32> -> vector<8x128xf32>
    %168 = arith.addf %166, %167 : vector<8x128xf32>
    %169 = vector.extract_strided_slice %168 {offsets = [0, 0], sizes = [8, 96], strides = [1, 1]} : vector<8x128xf32> to vector<8x96xf32>
    %170 = arith.negf %169 : vector<8x96xf32>
    %171 = math.exp %170 : vector<8x96xf32>
    %cst_81 = arith.constant 1.000000e+00 : f32
    %172 = vector.broadcast %cst_81 : f32 to vector<8x96xf32>
    %173 = arith.addf %172, %171 : vector<8x96xf32>
    %174 = arith.divf %172, %173 : vector<8x96xf32>
    %175 = vector.extract_strided_slice %174 {offsets = [0, 0], sizes = [8, 32], strides = [1, 1]} : vector<8x96xf32> to vector<8x32xf32>
    %176 = vector.extract_strided_slice %174 {offsets = [0, 32], sizes = [8, 32], strides = [1, 1]} : vector<8x96xf32> to vector<8x32xf32>
    %177 = vector.extract_strided_slice %174 {offsets = [0, 64], sizes = [8, 32], strides = [1, 1]} : vector<8x96xf32> to vector<8x32xf32>
    %178 = vector.extract_strided_slice %168 {offsets = [0, 96], sizes = [8, 32], strides = [1, 1]} : vector<8x128xf32> to vector<8x32xf32>
    %179 = math.tanh %178 : vector<8x32xf32>
    %180 = arith.mulf %176, %163 : vector<8x32xf32>
    %181 = arith.mulf %175, %179 : vector<8x32xf32>
    %182 = arith.addf %180, %181 : vector<8x32xf32>
    %183 = math.tanh %182 : vector<8x32xf32>
    %184 = arith.mulf %177, %183 : vector<8x32xf32>
    %185 = vector.broadcast %c4_i32 : i32 to vector<8x1xi32>
    %186 = arith.cmpi sgt, %0, %185 : vector<8x1xi32>
    %187 = vector.shape_cast %186 : vector<8x1xi1> to vector<8x1xi1>
    %188 = vector.broadcast %187 : vector<8x1xi1> to vector<8x32xi1>
    %189 = arith.select %188, %184, %162 : vector<8x32xi1>, vector<8x32xf32>
    %190 = vector.shape_cast %186 : vector<8x1xi1> to vector<8x1xi1>
    %191 = vector.broadcast %190 : vector<8x1xi1> to vector<8x32xi1>
    %192 = arith.select %191, %182, %163 : vector<8x32xi1>, vector<8x32xf32>
    %c0_82 = arith.constant 0 : index
    %c0_83 = arith.constant 0 : index
    %193 = vector.load %arg11[%c0_82, %c0_83] : memref<8x32xf32, #tpu.memory_space<vmem>>, vector<8x32xf32>
    tpu.vector_store %arg11[%c0_82, %c0_83], %189 {strides = array<i32>} : memref<8x32xf32, #tpu.memory_space<vmem>>, vector<8x32xf32>,
    %c0_84 = arith.constant 0 : index
    %c0_85 = arith.constant 0 : index
    %194 = vector.load %arg12[%c0_84, %c0_85] : memref<8x32xf32, #tpu.memory_space<vmem>>, vector<8x32xf32>
    tpu.vector_store %arg12[%c0_84, %c0_85], %192 {strides = array<i32>} : memref<8x32xf32, #tpu.memory_space<vmem>>, vector<8x32xf32>,
    %195 = arith.index_cast %c4_i32 : i32 to index
    %c0_86 = arith.constant 0 : index
    %c0_87 = arith.constant 0 : index
    %196 = vector.load %arg10[%195, %c0_86, %c0_87] : memref<6x8x32xf32, #tpu.memory_space<vmem>>, vector<1x8x32xf32>
    %197 = vector.shape_cast %196 : vector<1x8x32xf32> to vector<8x32xf32>
    %198 = vector.shape_cast %189 : vector<8x32xf32> to vector<1x8x32xf32>
    tpu.vector_store %arg10[%195, %c0_86, %c0_87], %198 {strides = array<i32>} : memref<6x8x32xf32, #tpu.memory_space<vmem>>, vector<1x8x32xf32>,
    %c5_i32 = arith.constant 5 : i32
    %c0_88 = arith.constant 0 : index
    %c0_89 = arith.constant 0 : index
    %199 = vector.load %arg11[%c0_88, %c0_89] : memref<8x32xf32, #tpu.memory_space<vmem>>, vector<8x32xf32>
    %c0_90 = arith.constant 0 : index
    %c0_91 = arith.constant 0 : index
    %200 = vector.load %arg12[%c0_90, %c0_91] : memref<8x32xf32, #tpu.memory_space<vmem>>, vector<8x32xf32>
    %201 = arith.index_cast %c5_i32 : i32 to index
    %c0_92 = arith.constant 0 : index
    %c0_93 = arith.constant 0 : index
    %202 = vector.load %arg9[%201, %c0_92, %c0_93] : memref<6x8x128xf32, #tpu.memory_space<vmem>>, vector<1x8x128xf32>
    %203 = vector.shape_cast %202 : vector<1x8x128xf32> to vector<8x128xf32>
    %cst_94 = arith.constant dense<0.000000e+00> : vector<8x128xf32>
    %204 = tpu.matmul %199, %2, %cst_94 {dimension_numbers = #tpu.dot_dimension_numbers<[1], [0], [0], [1], [0, 0, 1, 1], [], []>} : vector<8x32xf32>, vector<32x128xf32>, vector<8x128xf32> -> vector<8x128xf32>
    %205 = arith.addf %203, %204 : vector<8x128xf32>
    %206 = vector.extract_strided_slice %205 {offsets = [0, 0], sizes = [8, 96], strides = [1, 1]} : vector<8x128xf32> to vector<8x96xf32>
    %207 = arith.negf %206 : vector<8x96xf32>
    %208 = math.exp %207 : vector<8x96xf32>
    %cst_95 = arith.constant 1.000000e+00 : f32
    %209 = vector.broadcast %cst_95 : f32 to vector<8x96xf32>
    %210 = arith.addf %209, %208 : vector<8x96xf32>
    %211 = arith.divf %209, %210 : vector<8x96xf32>
    %212 = vector.extract_strided_slice %211 {offsets = [0, 0], sizes = [8, 32], strides = [1, 1]} : vector<8x96xf32> to vector<8x32xf32>
    %213 = vector.extract_strided_slice %211 {offsets = [0, 32], sizes = [8, 32], strides = [1, 1]} : vector<8x96xf32> to vector<8x32xf32>
    %214 = vector.extract_strided_slice %211 {offsets = [0, 64], sizes = [8, 32], strides = [1, 1]} : vector<8x96xf32> to vector<8x32xf32>
    %215 = vector.extract_strided_slice %205 {offsets = [0, 96], sizes = [8, 32], strides = [1, 1]} : vector<8x128xf32> to vector<8x32xf32>
    %216 = math.tanh %215 : vector<8x32xf32>
    %217 = arith.mulf %213, %200 : vector<8x32xf32>
    %218 = arith.mulf %212, %216 : vector<8x32xf32>
    %219 = arith.addf %217, %218 : vector<8x32xf32>
    %220 = math.tanh %219 : vector<8x32xf32>
    %221 = arith.mulf %214, %220 : vector<8x32xf32>
    %222 = vector.broadcast %c5_i32 : i32 to vector<8x1xi32>
    %223 = arith.cmpi sgt, %0, %222 : vector<8x1xi32>
    %224 = vector.shape_cast %223 : vector<8x1xi1> to vector<8x1xi1>
    %225 = vector.broadcast %224 : vector<8x1xi1> to vector<8x32xi1>
    %226 = arith.select %225, %221, %199 : vector<8x32xi1>, vector<8x32xf32>
    %227 = vector.shape_cast %223 : vector<8x1xi1> to vector<8x1xi1>
    %228 = vector.broadcast %227 : vector<8x1xi1> to vector<8x32xi1>
    %229 = arith.select %228, %219, %200 : vector<8x32xi1>, vector<8x32xf32>
    %c0_96 = arith.constant 0 : index
    %c0_97 = arith.constant 0 : index
    %230 = vector.load %arg11[%c0_96, %c0_97] : memref<8x32xf32, #tpu.memory_space<vmem>>, vector<8x32xf32>
    tpu.vector_store %arg11[%c0_96, %c0_97], %226 {strides = array<i32>} : memref<8x32xf32, #tpu.memory_space<vmem>>, vector<8x32xf32>,
    %c0_98 = arith.constant 0 : index
    %c0_99 = arith.constant 0 : index
    %231 = vector.load %arg12[%c0_98, %c0_99] : memref<8x32xf32, #tpu.memory_space<vmem>>, vector<8x32xf32>
    tpu.vector_store %arg12[%c0_98, %c0_99], %229 {strides = array<i32>} : memref<8x32xf32, #tpu.memory_space<vmem>>, vector<8x32xf32>,
    %232 = arith.index_cast %c5_i32 : i32 to index
    %c0_100 = arith.constant 0 : index
    %c0_101 = arith.constant 0 : index
    %233 = vector.load %arg10[%232, %c0_100, %c0_101] : memref<6x8x32xf32, #tpu.memory_space<vmem>>, vector<1x8x32xf32>
    %234 = vector.shape_cast %233 : vector<1x8x32xf32> to vector<8x32xf32>
    %235 = vector.shape_cast %226 : vector<8x32xf32> to vector<1x8x32xf32>
    tpu.vector_store %arg10[%232, %c0_100, %c0_101], %235 {strides = array<i32>} : memref<6x8x32xf32, #tpu.memory_space<vmem>>, vector<1x8x32xf32>,
    %c6_i32 = arith.constant 6 : i32
    %c0_102 = arith.constant 0 : index
    %c0_103 = arith.constant 0 : index
    %236 = vector.load %arg5[%c0_102, %c0_103] : memref<32x128xf32, #tpu.memory_space<vmem>>, vector<32x128xf32>
    %c0_104 = arith.constant 0 : index
    %c0_105 = arith.constant 0 : index
    %237 = vector.load %arg6[%c0_104, %c0_105] : memref<32x128xf32, #tpu.memory_space<vmem>>, vector<32x128xf32>
    %c0_106 = arith.constant 0 : index
    %c0_107 = arith.constant 0 : index
    %238 = vector.load %arg7[%c0_106, %c0_107] : memref<1x128xf32, #tpu.memory_space<vmem>>, vector<1x128xf32>
    %c0_108 = arith.constant 0 : index
    %c0_109 = arith.constant 0 : index
    %c0_110 = arith.constant 0 : index
    %239 = vector.load %arg10[%c0_108, %c0_109, %c0_110] : memref<6x8x32xf32, #tpu.memory_space<vmem>>, vector<6x8x32xf32>
    %240 = vector.shape_cast %239 : vector<6x8x32xf32> to vector<48x32xf32>
    %cst_111 = arith.constant dense<0.000000e+00> : vector<48x128xf32>
    %241 = tpu.matmul %240, %236, %cst_111 {dimension_numbers = #tpu.dot_dimension_numbers<[1], [0], [0], [1], [0, 0, 1, 1], [], []>} : vector<48x32xf32>, vector<32x128xf32>, vector<48x128xf32> -> vector<48x128xf32>
    %242 = vector.broadcast %238 : vector<1x128xf32> to vector<48x128xf32>
    %243 = arith.addf %241, %242 : vector<48x128xf32>
    %244 = vector.shape_cast %243 : vector<48x128xf32> to vector<6x8x128xf32>
    %c0_112 = arith.constant 0 : index
    %c0_113 = arith.constant 0 : index
    %c0_114 = arith.constant 0 : index
    %245 = vector.load %arg9[%c0_112, %c0_113, %c0_114] : memref<6x8x128xf32, #tpu.memory_space<vmem>>, vector<6x8x128xf32>
    tpu.vector_store %arg9[%c0_112, %c0_113, %c0_114], %244 {strides = array<i32>} : memref<6x8x128xf32, #tpu.memory_space<vmem>>, vector<6x8x128xf32>,
    %cst_115 = arith.constant 0.000000e+00 : f32
    %246 = vector.broadcast %cst_115 : f32 to vector<8x32xf32>
    %c0_116 = arith.constant 0 : index
    %c0_117 = arith.constant 0 : index
    %247 = vector.load %arg11[%c0_116, %c0_117] : memref<8x32xf32, #tpu.memory_space<vmem>>, vector<8x32xf32>
    tpu.vector_store %arg11[%c0_116, %c0_117], %246 {strides = array<i32>} : memref<8x32xf32, #tpu.memory_space<vmem>>, vector<8x32xf32>,
    %cst_118 = arith.constant 0.000000e+00 : f32
    %248 = vector.broadcast %cst_118 : f32 to vector<8x32xf32>
    %c0_119 = arith.constant 0 : index
    %c0_120 = arith.constant 0 : index
    %249 = vector.load %arg12[%c0_119, %c0_120] : memref<8x32xf32, #tpu.memory_space<vmem>>, vector<8x32xf32>
    tpu.vector_store %arg12[%c0_119, %c0_120], %248 {strides = array<i32>} : memref<8x32xf32, #tpu.memory_space<vmem>>, vector<8x32xf32>,
    %c0_i32_121 = arith.constant 0 : i32
    %c0_122 = arith.constant 0 : index
    %c0_123 = arith.constant 0 : index
    %250 = vector.load %arg11[%c0_122, %c0_123] : memref<8x32xf32, #tpu.memory_space<vmem>>, vector<8x32xf32>
    %c0_124 = arith.constant 0 : index
    %c0_125 = arith.constant 0 : index
    %251 = vector.load %arg12[%c0_124, %c0_125] : memref<8x32xf32, #tpu.memory_space<vmem>>, vector<8x32xf32>
    %252 = arith.index_cast %c0_i32_121 : i32 to index
    %c0_126 = arith.constant 0 : index
    %c0_127 = arith.constant 0 : index
    %253 = vector.load %arg9[%252, %c0_126, %c0_127] : memref<6x8x128xf32, #tpu.memory_space<vmem>>, vector<1x8x128xf32>
    %254 = vector.shape_cast %253 : vector<1x8x128xf32> to vector<8x128xf32>
    %cst_128 = arith.constant dense<0.000000e+00> : vector<8x128xf32>
    %255 = tpu.matmul %250, %237, %cst_128 {dimension_numbers = #tpu.dot_dimension_numbers<[1], [0], [0], [1], [0, 0, 1, 1], [], []>} : vector<8x32xf32>, vector<32x128xf32>, vector<8x128xf32> -> vector<8x128xf32>
    %256 = arith.addf %254, %255 : vector<8x128xf32>
    %257 = vector.extract_strided_slice %256 {offsets = [0, 0], sizes = [8, 96], strides = [1, 1]} : vector<8x128xf32> to vector<8x96xf32>
    %258 = arith.negf %257 : vector<8x96xf32>
    %259 = math.exp %258 : vector<8x96xf32>
    %cst_129 = arith.constant 1.000000e+00 : f32
    %260 = vector.broadcast %cst_129 : f32 to vector<8x96xf32>
    %261 = arith.addf %260, %259 : vector<8x96xf32>
    %262 = arith.divf %260, %261 : vector<8x96xf32>
    %263 = vector.extract_strided_slice %262 {offsets = [0, 0], sizes = [8, 32], strides = [1, 1]} : vector<8x96xf32> to vector<8x32xf32>
    %264 = vector.extract_strided_slice %262 {offsets = [0, 32], sizes = [8, 32], strides = [1, 1]} : vector<8x96xf32> to vector<8x32xf32>
    %265 = vector.extract_strided_slice %262 {offsets = [0, 64], sizes = [8, 32], strides = [1, 1]} : vector<8x96xf32> to vector<8x32xf32>
    %266 = vector.extract_strided_slice %256 {offsets = [0, 96], sizes = [8, 32], strides = [1, 1]} : vector<8x128xf32> to vector<8x32xf32>
    %267 = math.tanh %266 : vector<8x32xf32>
    %268 = arith.mulf %264, %251 : vector<8x32xf32>
    %269 = arith.mulf %263, %267 : vector<8x32xf32>
    %270 = arith.addf %268, %269 : vector<8x32xf32>
    %271 = math.tanh %270 : vector<8x32xf32>
    %272 = arith.mulf %265, %271 : vector<8x32xf32>
    %273 = vector.broadcast %c0_i32_121 : i32 to vector<8x1xi32>
    %274 = arith.cmpi sgt, %0, %273 : vector<8x1xi32>
    %275 = vector.shape_cast %274 : vector<8x1xi1> to vector<8x1xi1>
    %276 = vector.broadcast %275 : vector<8x1xi1> to vector<8x32xi1>
    %277 = arith.select %276, %272, %250 : vector<8x32xi1>, vector<8x32xf32>
    %278 = vector.shape_cast %274 : vector<8x1xi1> to vector<8x1xi1>
    %279 = vector.broadcast %278 : vector<8x1xi1> to vector<8x32xi1>
    %280 = arith.select %279, %270, %251 : vector<8x32xi1>, vector<8x32xf32>
    %c0_130 = arith.constant 0 : index
    %c0_131 = arith.constant 0 : index
    %281 = vector.load %arg11[%c0_130, %c0_131] : memref<8x32xf32, #tpu.memory_space<vmem>>, vector<8x32xf32>
    tpu.vector_store %arg11[%c0_130, %c0_131], %277 {strides = array<i32>} : memref<8x32xf32, #tpu.memory_space<vmem>>, vector<8x32xf32>,
    %c0_132 = arith.constant 0 : index
    %c0_133 = arith.constant 0 : index
    %282 = vector.load %arg12[%c0_132, %c0_133] : memref<8x32xf32, #tpu.memory_space<vmem>>, vector<8x32xf32>
    tpu.vector_store %arg12[%c0_132, %c0_133], %280 {strides = array<i32>} : memref<8x32xf32, #tpu.memory_space<vmem>>, vector<8x32xf32>,
    %c1_i32_134 = arith.constant 1 : i32
    %c0_135 = arith.constant 0 : index
    %c0_136 = arith.constant 0 : index
    %283 = vector.load %arg11[%c0_135, %c0_136] : memref<8x32xf32, #tpu.memory_space<vmem>>, vector<8x32xf32>
    %c0_137 = arith.constant 0 : index
    %c0_138 = arith.constant 0 : index
    %284 = vector.load %arg12[%c0_137, %c0_138] : memref<8x32xf32, #tpu.memory_space<vmem>>, vector<8x32xf32>
    %285 = arith.index_cast %c1_i32_134 : i32 to index
    %c0_139 = arith.constant 0 : index
    %c0_140 = arith.constant 0 : index
    %286 = vector.load %arg9[%285, %c0_139, %c0_140] : memref<6x8x128xf32, #tpu.memory_space<vmem>>, vector<1x8x128xf32>
    %287 = vector.shape_cast %286 : vector<1x8x128xf32> to vector<8x128xf32>
    %cst_141 = arith.constant dense<0.000000e+00> : vector<8x128xf32>
    %288 = tpu.matmul %283, %237, %cst_141 {dimension_numbers = #tpu.dot_dimension_numbers<[1], [0], [0], [1], [0, 0, 1, 1], [], []>} : vector<8x32xf32>, vector<32x128xf32>, vector<8x128xf32> -> vector<8x128xf32>
    %289 = arith.addf %287, %288 : vector<8x128xf32>
    %290 = vector.extract_strided_slice %289 {offsets = [0, 0], sizes = [8, 96], strides = [1, 1]} : vector<8x128xf32> to vector<8x96xf32>
    %291 = arith.negf %290 : vector<8x96xf32>
    %292 = math.exp %291 : vector<8x96xf32>
    %cst_142 = arith.constant 1.000000e+00 : f32
    %293 = vector.broadcast %cst_142 : f32 to vector<8x96xf32>
    %294 = arith.addf %293, %292 : vector<8x96xf32>
    %295 = arith.divf %293, %294 : vector<8x96xf32>
    %296 = vector.extract_strided_slice %295 {offsets = [0, 0], sizes = [8, 32], strides = [1, 1]} : vector<8x96xf32> to vector<8x32xf32>
    %297 = vector.extract_strided_slice %295 {offsets = [0, 32], sizes = [8, 32], strides = [1, 1]} : vector<8x96xf32> to vector<8x32xf32>
    %298 = vector.extract_strided_slice %295 {offsets = [0, 64], sizes = [8, 32], strides = [1, 1]} : vector<8x96xf32> to vector<8x32xf32>
    %299 = vector.extract_strided_slice %289 {offsets = [0, 96], sizes = [8, 32], strides = [1, 1]} : vector<8x128xf32> to vector<8x32xf32>
    %300 = math.tanh %299 : vector<8x32xf32>
    %301 = arith.mulf %297, %284 : vector<8x32xf32>
    %302 = arith.mulf %296, %300 : vector<8x32xf32>
    %303 = arith.addf %301, %302 : vector<8x32xf32>
    %304 = math.tanh %303 : vector<8x32xf32>
    %305 = arith.mulf %298, %304 : vector<8x32xf32>
    %306 = vector.broadcast %c1_i32_134 : i32 to vector<8x1xi32>
    %307 = arith.cmpi sgt, %0, %306 : vector<8x1xi32>
    %308 = vector.shape_cast %307 : vector<8x1xi1> to vector<8x1xi1>
    %309 = vector.broadcast %308 : vector<8x1xi1> to vector<8x32xi1>
    %310 = arith.select %309, %305, %283 : vector<8x32xi1>, vector<8x32xf32>
    %311 = vector.shape_cast %307 : vector<8x1xi1> to vector<8x1xi1>
    %312 = vector.broadcast %311 : vector<8x1xi1> to vector<8x32xi1>
    %313 = arith.select %312, %303, %284 : vector<8x32xi1>, vector<8x32xf32>
    %c0_143 = arith.constant 0 : index
    %c0_144 = arith.constant 0 : index
    %314 = vector.load %arg11[%c0_143, %c0_144] : memref<8x32xf32, #tpu.memory_space<vmem>>, vector<8x32xf32>
    tpu.vector_store %arg11[%c0_143, %c0_144], %310 {strides = array<i32>} : memref<8x32xf32, #tpu.memory_space<vmem>>, vector<8x32xf32>,
    %c0_145 = arith.constant 0 : index
    %c0_146 = arith.constant 0 : index
    %315 = vector.load %arg12[%c0_145, %c0_146] : memref<8x32xf32, #tpu.memory_space<vmem>>, vector<8x32xf32>
    tpu.vector_store %arg12[%c0_145, %c0_146], %313 {strides = array<i32>} : memref<8x32xf32, #tpu.memory_space<vmem>>, vector<8x32xf32>,
    %c2_i32_147 = arith.constant 2 : i32
    %c0_148 = arith.constant 0 : index
    %c0_149 = arith.constant 0 : index
    %316 = vector.load %arg11[%c0_148, %c0_149] : memref<8x32xf32, #tpu.memory_space<vmem>>, vector<8x32xf32>
    %c0_150 = arith.constant 0 : index
    %c0_151 = arith.constant 0 : index
    %317 = vector.load %arg12[%c0_150, %c0_151] : memref<8x32xf32, #tpu.memory_space<vmem>>, vector<8x32xf32>
    %318 = arith.index_cast %c2_i32_147 : i32 to index
    %c0_152 = arith.constant 0 : index
    %c0_153 = arith.constant 0 : index
    %319 = vector.load %arg9[%318, %c0_152, %c0_153] : memref<6x8x128xf32, #tpu.memory_space<vmem>>, vector<1x8x128xf32>
    %320 = vector.shape_cast %319 : vector<1x8x128xf32> to vector<8x128xf32>
    %cst_154 = arith.constant dense<0.000000e+00> : vector<8x128xf32>
    %321 = tpu.matmul %316, %237, %cst_154 {dimension_numbers = #tpu.dot_dimension_numbers<[1], [0], [0], [1], [0, 0, 1, 1], [], []>} : vector<8x32xf32>, vector<32x128xf32>, vector<8x128xf32> -> vector<8x128xf32>
    %322 = arith.addf %320, %321 : vector<8x128xf32>
    %323 = vector.extract_strided_slice %322 {offsets = [0, 0], sizes = [8, 96], strides = [1, 1]} : vector<8x128xf32> to vector<8x96xf32>
    %324 = arith.negf %323 : vector<8x96xf32>
    %325 = math.exp %324 : vector<8x96xf32>
    %cst_155 = arith.constant 1.000000e+00 : f32
    %326 = vector.broadcast %cst_155 : f32 to vector<8x96xf32>
    %327 = arith.addf %326, %325 : vector<8x96xf32>
    %328 = arith.divf %326, %327 : vector<8x96xf32>
    %329 = vector.extract_strided_slice %328 {offsets = [0, 0], sizes = [8, 32], strides = [1, 1]} : vector<8x96xf32> to vector<8x32xf32>
    %330 = vector.extract_strided_slice %328 {offsets = [0, 32], sizes = [8, 32], strides = [1, 1]} : vector<8x96xf32> to vector<8x32xf32>
    %331 = vector.extract_strided_slice %328 {offsets = [0, 64], sizes = [8, 32], strides = [1, 1]} : vector<8x96xf32> to vector<8x32xf32>
    %332 = vector.extract_strided_slice %322 {offsets = [0, 96], sizes = [8, 32], strides = [1, 1]} : vector<8x128xf32> to vector<8x32xf32>
    %333 = math.tanh %332 : vector<8x32xf32>
    %334 = arith.mulf %330, %317 : vector<8x32xf32>
    %335 = arith.mulf %329, %333 : vector<8x32xf32>
    %336 = arith.addf %334, %335 : vector<8x32xf32>
    %337 = math.tanh %336 : vector<8x32xf32>
    %338 = arith.mulf %331, %337 : vector<8x32xf32>
    %339 = vector.broadcast %c2_i32_147 : i32 to vector<8x1xi32>
    %340 = arith.cmpi sgt, %0, %339 : vector<8x1xi32>
    %341 = vector.shape_cast %340 : vector<8x1xi1> to vector<8x1xi1>
    %342 = vector.broadcast %341 : vector<8x1xi1> to vector<8x32xi1>
    %343 = arith.select %342, %338, %316 : vector<8x32xi1>, vector<8x32xf32>
    %344 = vector.shape_cast %340 : vector<8x1xi1> to vector<8x1xi1>
    %345 = vector.broadcast %344 : vector<8x1xi1> to vector<8x32xi1>
    %346 = arith.select %345, %336, %317 : vector<8x32xi1>, vector<8x32xf32>
    %c0_156 = arith.constant 0 : index
    %c0_157 = arith.constant 0 : index
    %347 = vector.load %arg11[%c0_156, %c0_157] : memref<8x32xf32, #tpu.memory_space<vmem>>, vector<8x32xf32>
    tpu.vector_store %arg11[%c0_156, %c0_157], %343 {strides = array<i32>} : memref<8x32xf32, #tpu.memory_space<vmem>>, vector<8x32xf32>,
    %c0_158 = arith.constant 0 : index
    %c0_159 = arith.constant 0 : index
    %348 = vector.load %arg12[%c0_158, %c0_159] : memref<8x32xf32, #tpu.memory_space<vmem>>, vector<8x32xf32>
    tpu.vector_store %arg12[%c0_158, %c0_159], %346 {strides = array<i32>} : memref<8x32xf32, #tpu.memory_space<vmem>>, vector<8x32xf32>,
    %c3_i32_160 = arith.constant 3 : i32
    %c0_161 = arith.constant 0 : index
    %c0_162 = arith.constant 0 : index
    %349 = vector.load %arg11[%c0_161, %c0_162] : memref<8x32xf32, #tpu.memory_space<vmem>>, vector<8x32xf32>
    %c0_163 = arith.constant 0 : index
    %c0_164 = arith.constant 0 : index
    %350 = vector.load %arg12[%c0_163, %c0_164] : memref<8x32xf32, #tpu.memory_space<vmem>>, vector<8x32xf32>
    %351 = arith.index_cast %c3_i32_160 : i32 to index
    %c0_165 = arith.constant 0 : index
    %c0_166 = arith.constant 0 : index
    %352 = vector.load %arg9[%351, %c0_165, %c0_166] : memref<6x8x128xf32, #tpu.memory_space<vmem>>, vector<1x8x128xf32>
    %353 = vector.shape_cast %352 : vector<1x8x128xf32> to vector<8x128xf32>
    %cst_167 = arith.constant dense<0.000000e+00> : vector<8x128xf32>
    %354 = tpu.matmul %349, %237, %cst_167 {dimension_numbers = #tpu.dot_dimension_numbers<[1], [0], [0], [1], [0, 0, 1, 1], [], []>} : vector<8x32xf32>, vector<32x128xf32>, vector<8x128xf32> -> vector<8x128xf32>
    %355 = arith.addf %353, %354 : vector<8x128xf32>
    %356 = vector.extract_strided_slice %355 {offsets = [0, 0], sizes = [8, 96], strides = [1, 1]} : vector<8x128xf32> to vector<8x96xf32>
    %357 = arith.negf %356 : vector<8x96xf32>
    %358 = math.exp %357 : vector<8x96xf32>
    %cst_168 = arith.constant 1.000000e+00 : f32
    %359 = vector.broadcast %cst_168 : f32 to vector<8x96xf32>
    %360 = arith.addf %359, %358 : vector<8x96xf32>
    %361 = arith.divf %359, %360 : vector<8x96xf32>
    %362 = vector.extract_strided_slice %361 {offsets = [0, 0], sizes = [8, 32], strides = [1, 1]} : vector<8x96xf32> to vector<8x32xf32>
    %363 = vector.extract_strided_slice %361 {offsets = [0, 32], sizes = [8, 32], strides = [1, 1]} : vector<8x96xf32> to vector<8x32xf32>
    %364 = vector.extract_strided_slice %361 {offsets = [0, 64], sizes = [8, 32], strides = [1, 1]} : vector<8x96xf32> to vector<8x32xf32>
    %365 = vector.extract_strided_slice %355 {offsets = [0, 96], sizes = [8, 32], strides = [1, 1]} : vector<8x128xf32> to vector<8x32xf32>
    %366 = math.tanh %365 : vector<8x32xf32>
    %367 = arith.mulf %363, %350 : vector<8x32xf32>
    %368 = arith.mulf %362, %366 : vector<8x32xf32>
    %369 = arith.addf %367, %368 : vector<8x32xf32>
    %370 = math.tanh %369 : vector<8x32xf32>
    %371 = arith.mulf %364, %370 : vector<8x32xf32>
    %372 = vector.broadcast %c3_i32_160 : i32 to vector<8x1xi32>
    %373 = arith.cmpi sgt, %0, %372 : vector<8x1xi32>
    %374 = vector.shape_cast %373 : vector<8x1xi1> to vector<8x1xi1>
    %375 = vector.broadcast %374 : vector<8x1xi1> to vector<8x32xi1>
    %376 = arith.select %375, %371, %349 : vector<8x32xi1>, vector<8x32xf32>
    %377 = vector.shape_cast %373 : vector<8x1xi1> to vector<8x1xi1>
    %378 = vector.broadcast %377 : vector<8x1xi1> to vector<8x32xi1>
    %379 = arith.select %378, %369, %350 : vector<8x32xi1>, vector<8x32xf32>
    %c0_169 = arith.constant 0 : index
    %c0_170 = arith.constant 0 : index
    %380 = vector.load %arg11[%c0_169, %c0_170] : memref<8x32xf32, #tpu.memory_space<vmem>>, vector<8x32xf32>
    tpu.vector_store %arg11[%c0_169, %c0_170], %376 {strides = array<i32>} : memref<8x32xf32, #tpu.memory_space<vmem>>, vector<8x32xf32>,
    %c0_171 = arith.constant 0 : index
    %c0_172 = arith.constant 0 : index
    %381 = vector.load %arg12[%c0_171, %c0_172] : memref<8x32xf32, #tpu.memory_space<vmem>>, vector<8x32xf32>
    tpu.vector_store %arg12[%c0_171, %c0_172], %379 {strides = array<i32>} : memref<8x32xf32, #tpu.memory_space<vmem>>, vector<8x32xf32>,
    %c4_i32_173 = arith.constant 4 : i32
    %c0_174 = arith.constant 0 : index
    %c0_175 = arith.constant 0 : index
    %382 = vector.load %arg11[%c0_174, %c0_175] : memref<8x32xf32, #tpu.memory_space<vmem>>, vector<8x32xf32>
    %c0_176 = arith.constant 0 : index
    %c0_177 = arith.constant 0 : index
    %383 = vector.load %arg12[%c0_176, %c0_177] : memref<8x32xf32, #tpu.memory_space<vmem>>, vector<8x32xf32>
    %384 = arith.index_cast %c4_i32_173 : i32 to index
    %c0_178 = arith.constant 0 : index
    %c0_179 = arith.constant 0 : index
    %385 = vector.load %arg9[%384, %c0_178, %c0_179] : memref<6x8x128xf32, #tpu.memory_space<vmem>>, vector<1x8x128xf32>
    %386 = vector.shape_cast %385 : vector<1x8x128xf32> to vector<8x128xf32>
    %cst_180 = arith.constant dense<0.000000e+00> : vector<8x128xf32>
    %387 = tpu.matmul %382, %237, %cst_180 {dimension_numbers = #tpu.dot_dimension_numbers<[1], [0], [0], [1], [0, 0, 1, 1], [], []>} : vector<8x32xf32>, vector<32x128xf32>, vector<8x128xf32> -> vector<8x128xf32>
    %388 = arith.addf %386, %387 : vector<8x128xf32>
    %389 = vector.extract_strided_slice %388 {offsets = [0, 0], sizes = [8, 96], strides = [1, 1]} : vector<8x128xf32> to vector<8x96xf32>
    %390 = arith.negf %389 : vector<8x96xf32>
    %391 = math.exp %390 : vector<8x96xf32>
    %cst_181 = arith.constant 1.000000e+00 : f32
    %392 = vector.broadcast %cst_181 : f32 to vector<8x96xf32>
    %393 = arith.addf %392, %391 : vector<8x96xf32>
    %394 = arith.divf %392, %393 : vector<8x96xf32>
    %395 = vector.extract_strided_slice %394 {offsets = [0, 0], sizes = [8, 32], strides = [1, 1]} : vector<8x96xf32> to vector<8x32xf32>
    %396 = vector.extract_strided_slice %394 {offsets = [0, 32], sizes = [8, 32], strides = [1, 1]} : vector<8x96xf32> to vector<8x32xf32>
    %397 = vector.extract_strided_slice %394 {offsets = [0, 64], sizes = [8, 32], strides = [1, 1]} : vector<8x96xf32> to vector<8x32xf32>
    %398 = vector.extract_strided_slice %388 {offsets = [0, 96], sizes = [8, 32], strides = [1, 1]} : vector<8x128xf32> to vector<8x32xf32>
    %399 = math.tanh %398 : vector<8x32xf32>
    %400 = arith.mulf %396, %383 : vector<8x32xf32>
    %401 = arith.mulf %395, %399 : vector<8x32xf32>
    %402 = arith.addf %400, %401 : vector<8x32xf32>
    %403 = math.tanh %402 : vector<8x32xf32>
    %404 = arith.mulf %397, %403 : vector<8x32xf32>
    %405 = vector.broadcast %c4_i32_173 : i32 to vector<8x1xi32>
    %406 = arith.cmpi sgt, %0, %405 : vector<8x1xi32>
    %407 = vector.shape_cast %406 : vector<8x1xi1> to vector<8x1xi1>
    %408 = vector.broadcast %407 : vector<8x1xi1> to vector<8x32xi1>
    %409 = arith.select %408, %404, %382 : vector<8x32xi1>, vector<8x32xf32>
    %410 = vector.shape_cast %406 : vector<8x1xi1> to vector<8x1xi1>
    %411 = vector.broadcast %410 : vector<8x1xi1> to vector<8x32xi1>
    %412 = arith.select %411, %402, %383 : vector<8x32xi1>, vector<8x32xf32>
    %c0_182 = arith.constant 0 : index
    %c0_183 = arith.constant 0 : index
    %413 = vector.load %arg11[%c0_182, %c0_183] : memref<8x32xf32, #tpu.memory_space<vmem>>, vector<8x32xf32>
    tpu.vector_store %arg11[%c0_182, %c0_183], %409 {strides = array<i32>} : memref<8x32xf32, #tpu.memory_space<vmem>>, vector<8x32xf32>,
    %c0_184 = arith.constant 0 : index
    %c0_185 = arith.constant 0 : index
    %414 = vector.load %arg12[%c0_184, %c0_185] : memref<8x32xf32, #tpu.memory_space<vmem>>, vector<8x32xf32>
    tpu.vector_store %arg12[%c0_184, %c0_185], %412 {strides = array<i32>} : memref<8x32xf32, #tpu.memory_space<vmem>>, vector<8x32xf32>,
    %c5_i32_186 = arith.constant 5 : i32
    %c0_187 = arith.constant 0 : index
    %c0_188 = arith.constant 0 : index
    %415 = vector.load %arg11[%c0_187, %c0_188] : memref<8x32xf32, #tpu.memory_space<vmem>>, vector<8x32xf32>
    %c0_189 = arith.constant 0 : index
    %c0_190 = arith.constant 0 : index
    %416 = vector.load %arg12[%c0_189, %c0_190] : memref<8x32xf32, #tpu.memory_space<vmem>>, vector<8x32xf32>
    %417 = arith.index_cast %c5_i32_186 : i32 to index
    %c0_191 = arith.constant 0 : index
    %c0_192 = arith.constant 0 : index
    %418 = vector.load %arg9[%417, %c0_191, %c0_192] : memref<6x8x128xf32, #tpu.memory_space<vmem>>, vector<1x8x128xf32>
    %419 = vector.shape_cast %418 : vector<1x8x128xf32> to vector<8x128xf32>
    %cst_193 = arith.constant dense<0.000000e+00> : vector<8x128xf32>
    %420 = tpu.matmul %415, %237, %cst_193 {dimension_numbers = #tpu.dot_dimension_numbers<[1], [0], [0], [1], [0, 0, 1, 1], [], []>} : vector<8x32xf32>, vector<32x128xf32>, vector<8x128xf32> -> vector<8x128xf32>
    %421 = arith.addf %419, %420 : vector<8x128xf32>
    %422 = vector.extract_strided_slice %421 {offsets = [0, 0], sizes = [8, 96], strides = [1, 1]} : vector<8x128xf32> to vector<8x96xf32>
    %423 = arith.negf %422 : vector<8x96xf32>
    %424 = math.exp %423 : vector<8x96xf32>
    %cst_194 = arith.constant 1.000000e+00 : f32
    %425 = vector.broadcast %cst_194 : f32 to vector<8x96xf32>
    %426 = arith.addf %425, %424 : vector<8x96xf32>
    %427 = arith.divf %425, %426 : vector<8x96xf32>
    %428 = vector.extract_strided_slice %427 {offsets = [0, 0], sizes = [8, 32], strides = [1, 1]} : vector<8x96xf32> to vector<8x32xf32>
    %429 = vector.extract_strided_slice %427 {offsets = [0, 32], sizes = [8, 32], strides = [1, 1]} : vector<8x96xf32> to vector<8x32xf32>
    %430 = vector.extract_strided_slice %427 {offsets = [0, 64], sizes = [8, 32], strides = [1, 1]} : vector<8x96xf32> to vector<8x32xf32>
    %431 = vector.extract_strided_slice %421 {offsets = [0, 96], sizes = [8, 32], strides = [1, 1]} : vector<8x128xf32> to vector<8x32xf32>
    %432 = math.tanh %431 : vector<8x32xf32>
    %433 = arith.mulf %429, %416 : vector<8x32xf32>
    %434 = arith.mulf %428, %432 : vector<8x32xf32>
    %435 = arith.addf %433, %434 : vector<8x32xf32>
    %436 = math.tanh %435 : vector<8x32xf32>
    %437 = arith.mulf %430, %436 : vector<8x32xf32>
    %438 = vector.broadcast %c5_i32_186 : i32 to vector<8x1xi32>
    %439 = arith.cmpi sgt, %0, %438 : vector<8x1xi32>
    %440 = vector.shape_cast %439 : vector<8x1xi1> to vector<8x1xi1>
    %441 = vector.broadcast %440 : vector<8x1xi1> to vector<8x32xi1>
    %442 = arith.select %441, %437, %415 : vector<8x32xi1>, vector<8x32xf32>
    %443 = vector.shape_cast %439 : vector<8x1xi1> to vector<8x1xi1>
    %444 = vector.broadcast %443 : vector<8x1xi1> to vector<8x32xi1>
    %445 = arith.select %444, %435, %416 : vector<8x32xi1>, vector<8x32xf32>
    %c0_195 = arith.constant 0 : index
    %c0_196 = arith.constant 0 : index
    %446 = vector.load %arg11[%c0_195, %c0_196] : memref<8x32xf32, #tpu.memory_space<vmem>>, vector<8x32xf32>
    tpu.vector_store %arg11[%c0_195, %c0_196], %442 {strides = array<i32>} : memref<8x32xf32, #tpu.memory_space<vmem>>, vector<8x32xf32>,
    %c0_197 = arith.constant 0 : index
    %c0_198 = arith.constant 0 : index
    %447 = vector.load %arg12[%c0_197, %c0_198] : memref<8x32xf32, #tpu.memory_space<vmem>>, vector<8x32xf32>
    tpu.vector_store %arg12[%c0_197, %c0_198], %445 {strides = array<i32>} : memref<8x32xf32, #tpu.memory_space<vmem>>, vector<8x32xf32>,
    %c6_i32_199 = arith.constant 6 : i32
    %c0_200 = arith.constant 0 : index
    %c0_201 = arith.constant 0 : index
    %448 = vector.load %arg11[%c0_200, %c0_201] : memref<8x32xf32, #tpu.memory_space<vmem>>, vector<8x32xf32>
    %c0_202 = arith.constant 0 : index
    %c0_203 = arith.constant 0 : index
    %449 = vector.load %arg8[%c0_202, %c0_203] : memref<8x32xf32, #tpu.memory_space<vmem>>, vector<8x32xf32>
    tpu.vector_store %arg8[%c0_202, %c0_203], %448 {strides = array<i32>} : memref<8x32xf32, #tpu.memory_space<vmem>>, vector<8x32xf32>,
    return
  }
}

</mosaic_0001>

<bundles_post_ra>
// kernel: tpu_custom_call.1
= control target key start
LH: loop header
LB: loop body
LE: loop exit
PB: predicated region body
PF: predicated region fallthrough
CT: control target
= control target key end

     0   :  { %13 = vsyncpa [#allocation7], 0  ;;  %s2863_s0 = inlined_call_operand.vmem [shape: s32[8,1], index: 0, kind: input, shape index: {}]   ;;  %s2864_s1 = inlined_call_operand.vmem [shape: f32[48,32], index: 1, kind: input, shape index: {}]   ;;  %s2865_s2 = inlined_call_operand.vmem [shape: f32[32,128], index: 2, kind: input, shape index: {}]   ;;  %s2866_s3 = inlined_call_operand.vmem [shape: f32[32,128], index: 3, kind: input, shape index: {}]   ;;  %s2867_s4 = inlined_call_operand.vmem [shape: f32[1,128], index: 4, kind: input, shape index: {}]   ;;  %s2868_s5 = inlined_call_operand.vmem [shape: f32[32,128], index: 5, kind: input, shape index: {}]   ;;  %s2869_s6 = inlined_call_operand.hbm [shape: f32[32,128], index: 6, kind: input, shape index: {}]   ;;  %s2870_s7 = inlined_call_operand.vmem [shape: f32[1,128], index: 7, kind: input, shape index: {}]   ;;  %s2871_s8 = inlined_call_operand.hbm [shape: f32[8,32], index: 8, kind: output, shape index: {}]  }
   0x1   :  { %14 = vsyncpa [#allocation8], 0  ;;  %s2368_s27 = smov [#allocation6]   ;;  %s2320_s9 = scalar_lea.hbm %s2869_s6, 512 }
   0x2   :  { %s32_s28 = sshll.u32 %s2368_s27, 4  ;;  %p2321_p0 = scmp.ne.s32.totalorder %s2869_s6, %s2320_s9  ;;  %s33_s28 = int_to_ptr.vmem [resolvable:$true] %s32_s28 }
   0x3   :  { %p2324_p1 = scmp.lt.u32.totalorder %s2320_s9, %s2869_s6 }
   0x5   :  { %p2326_p2 = pnand %p2324_p1, %p2321_p0 }
   0x7   :  { %2329 = shalt.err (!%p2326_p2)
}
   0x8   :  { %s2330_s14 = scalar_lea.vmem %s33_s28, 512  ;;  %p2335_p4 = scmp.lt.s32.totalorder %s33_s28, %s33_s28 }
   0x9   :  { %p2331_p3 = scmp.ne.s32.totalorder %s33_s28, %s2330_s14  ;;  %p2336_p5 = scmp.lt.s32.totalorder %s2330_s14, %s2330_s14 }
   0xb   :  { %p2337_p6 = por %p2336_p5, %p2335_p4 }
   0xd   :  { %p2338_p7 = pnand %p2337_p6, %p2331_p3 }
   0xf   :  { %2341 = shalt.err (!%p2338_p7)
}
  0x10   :  { %s2369_s15 = smov 128   ;;  %s2370_s16 = smov 8  }
  0x11   :  { %38 = dma.hbm_to_vmem [thread:$0]  %s2869_s6, 512, %s33_s28, [#allocation7], %s2369_s15, %s2369_s15, %s2370_s16  }
  0x12   :  { %2364 = dma.done.wait [#allocation7], 512  }
  0x13   :  { %2365 = vsyncadd [#allocation7], 4294966784  ;;  %vm66_vm0 = vcmask 261120   ;;  %v2371_v0 = vmov 0.0|0.0   ;;  %vm2372_vm1 = vmmov 0   ;;  %v2373_v1 = vmov 0.0  }
  0x14   :  { %2131 = vmatprep.subr.bf16.mxu1 %v2371_v0  ;;  %1982 = vmatprep.mubr.msk.f32.mxu1 %vm2372_vm1, %v2373_v1  ;;  %186 = vst.msk [vmem:[#allocation4] sm:$0xff] %vm66_vm0, %v2373_v1  ;;  %187 = vst.msk [vmem:[#allocation5] sm:$0xff] %vm66_vm0, %v2373_v1  ;;  %v45_v2 = vld [vmem:[%s2865_s2] sm:$0xff]  ;;  %v46_v3 = vld [vmem:[%s2865_s2 + $0x8] sm:$0xff]  ;;  %v2374_v24 = vmov 0   ;;  %s2375_s16 = smov 32  }
  0x15   :  { %v49_v4 = vld [vmem:[%s2866_s3] sm:$0xff]  ;;  %v2123_v5 = vpack.c.bf16 %v46_v3, %v45_v2  ;;  %v50_v6 = vld [vmem:[%s2866_s3 + $0x8] sm:$0xff]  ;;  %v47_v7 = vld [vmem:[%s2865_s2 + $0x10] sm:$0xff]  ;;  %2222 = vset.pattern.permute.xlu1 %v2374_v24  ;;  %2223 = vset.pattern.permute.xlu0 %v2374_v24  ;;  %s2376_s18 = smov 64  }
  0x16   :  { %v48_v8 = vld [vmem:[%s2865_s2 + $0x18] sm:$0xff]  ;;  %v2461_v9 = vpack.c.bf16 %v50_v6, %v49_v4  ;;  %v54_v11 = vld [vmem:[%s2864_s1] sm:$0xff]  ;;  %v51_v12 = vld [vmem:[%s2866_s3 + $0x10] sm:$0xff] }
  0x17   :  { %v2127_v10 = vpack.c.bf16 %v48_v8, %v47_v7  ;;  %v52_v13 = vld [vmem:[%s2866_s3 + $0x18] sm:$0xff]  ;;  %2124 = vmatprep.subr.bf16.mxu0 %v2123_v5  ;;  %1965 = vmatprep.mubr.msk.f32.mxu0 %vm66_vm0, %v54_v11  ;;  %v55_v15 = vld [vmem:[%s2864_s1 + $0x8] sm:$0xff]  ;;  %v2498_v17 = vld [vmem:[%s2867_s4] ss:$0 sm:$0xff] }
  0x18   :  { %2126 = vmatpush3.bf16.msra.mxu0 %v2123_v5  ;;  %2133 = vmatpush3.bf16.msra.mxu1 %v2461_v9  ;;  %v2474_v14 = vpack.c.bf16 %v52_v13, %v51_v12  ;;  %v2510_v30 = vld [vmem:[%s2863_s0] sm:$0xff]  ;;  %s2377_s0 = smov 96   ;;  %v56_v7 = vld [vmem:[%s2864_s1 + $0x10] sm:$0xff]  ;;  %v57_v8 = vld [vmem:[%s2864_s1 + $0x18] sm:$0xff] }
  0x19   :  { %2128 = vmatprep.subr.bf16.mxu0 %v2127_v10  ;;  %2134 = vmatprep.subr.bf16.mxu1 %v2371_v0  ;;  %vm293_vm2 = vcmp.gt.s32.totalorder %v2510_v30, 0  ;;  %vm421_vm4 = vcmp.gt.s32.totalorder %v2510_v30, 1  ;;  %v58_v12 = vld [vmem:[%s2864_s1 + $0x20] sm:$0xff]  ;;  %v59_v13 = vld [vmem:[%s2864_s1 + $0x28] sm:$0xff]  ;;  %vm550_vm6 = vcmp.gt.s32.totalorder %v2510_v30, 2  ;;  %vm679_vm8 = vcmp.gt.s32.totalorder %v2510_v30, 3 }
  0x1a   :  { %v294_v34 = vsel %vm293_vm2, 1, %v2374_v24  ;;  %v422_v48 = vsel %vm421_vm4, 1, %v2374_v24  ;;  %vm808_vm10 = vcmp.gt.s32.totalorder %v2510_v30, 4  ;;  %vm937_vm12 = vcmp.gt.s32.totalorder %v2510_v30, 5 }
  0x1b   :  { %v188_v16 = vld [vmem:[#allocation4] sm:$0xff]  ;;  %v189_v26 = vld [vmem:[#allocation5] sm:$0xff] }
  0x1c   :  { %2130 = vmatpush3.bf16.msra.mxu0 %v2127_v10  ;;  %2136 = vmatpush3.bf16.msra.mxu1 %v2474_v14 }
  0x1d   :  { %2137 = vmatprep.subr.bf16.mxu1 %v2371_v0  ;;  %2143 = vmatprep.subr.bf16.mxu0 %v2371_v0 }
  0x1f   :  { %1966 = vmatmul.mubr.msk.f32.vlgmr.msra.gmra.mrb[0].mxu0 %vm66_vm0, %v55_v15  ;;  %1983 = vmatmul.mubr.msk.f32.vlgmr.msra.gmra.mrb[0].mxu1 %vm66_vm0, %v188_v16 }
  0x20   :  { %2139 = vmatpush3.bf16.msra.mxu1 %v2461_v9  ;;  %1993 = vmatprep.mubr.msk.f32.mxu1 %vm2372_vm1, %v2373_v1 }
  0x21   :  { %2140 = vmatprep.subr.bf16.mxu1 %v2371_v0  ;;  %2145 = vmatpush3.bf16.msra.mxu0 %v2461_v9 }
  0x22   :  { %2146 = vmatprep.subr.bf16.mxu0 %v2371_v0  ;;  %1968 = vmatprep.mubr.msk.f32.mxu0 %vm66_vm0, %v56_v7 }
  0x23   :  { %1969 = vmatmul.mubr.msk.f32.gmra.mrb[2].mxu0 %vm66_vm0, %v57_v8 }
  0x24   :  { %2142 = vmatpush3.bf16.msra.mxu1 %v2474_v14  ;;  %1971 = vmatprep.mubr.msk.f32.mxu0 %vm66_vm0, %v58_v12 }
  0x25   :  { %2148 = vmatpush3.bf16.msra.mxu0 %v2474_v14  ;;  %2149 = vmatprep.subr.bf16.mxu1 %v2371_v0 }
  0x26   :  { %2155 = vmatprep.subr.bf16.mxu0 %v2371_v0 }
  0x27   :  { %1972 = vmatmul.mubr.msk.f32.gmra.mrb[4].mxu0 %vm66_vm0, %v59_v13 }
  0x28   :  { %2004 = vmatprep.mubr.msk.f32.mxu0 %vm2372_vm1, %v2373_v1 }
  0xf2   :  { %v2500_v18 = vpop.f32.mrb[0].mxu0  ;;  %v260_v19 = vpop.f32.mrb[0].mxu1 }
  0xf3   :  { %v151_v20 = vpop.f32.mrb[1].mxu0  ;;  %v1984_v21 = vpop.f32.mrb[1].mxu1  ;;  %v157_v51 = vadd.f32 %v2500_v18, %v2498_v17  ;;  %v551_v18 = vsel %vm550_vm6, 1, %v2374_v24 }
  0xf4   :  { %v152_v22 = vadd.f32 %v2498_v17, %v151_v20 }
  0xf6   :  { %v264_v23 = vadd.f32 %v260_v19, %v152_v22 }
  0xf8   :  { %2224 = vtanh.f32 %v264_v23  ;;  %v1847_v27 = vmul.f32 -1.442695, %v264_v23  ;;  %v1970_v23 = vpop.f32.mrb[2].mxu0 }
  0xfa   :  { %2226 = vpow2.f32 %v1847_v27 }
 0x102   :  { %v2225_v25 = vpop.eup %2224 }
 0x103   :  { %278 = vrot.lane.b32.xlu0 %v2225_v25, %s2375_s16  ;;  %v161_v25 = vpop.f32.mrb[3].mxu0 }
 0x104   :  { %v2227_v28 = vpop.eup %2226 }
 0x105   :  { %v268_v29 = vadd.f32 1.0, %v2227_v28  ;;  %v162_v28 = vadd.f32 %v2498_v17, %v161_v25 }
 0x107   :  { %273 = vrot.lane.b32.xlu0 %v189_v26, %s2375_s16  ;;  %2228 = vrcp.f32 %v268_v29  ;;  %v2585_v26 = vpop.f32.mrb[4].mxu0 }
 0x108   :  { %v2587_v27 = vpop.f32.mrb[5].mxu0 }
 0x111   :  { %v2229_v31 = vpop.eup %2228 }
 0x175   :  { %v279_v32 = vpop.permute.xlu0 %278 }
 0x176   :  { %v281_v33 = vmul.f32 %v2229_v31, %v279_v32 }
 0x178   :  { %283 = vrot.lane.b32.xlu1 %v281_v33, %s2375_s16 }
 0x179   :  { %v274_v35 = vpop.permute.xlu0 %273 }
 0x17a   :  { %v276_v36 = vmul.f32 %v2229_v31, %v274_v35 }
 0x17c   :  { %296 = vperm.xlu1 %2222, %v294_v34  }
 0x180   :  { %299 = vrot.lane.b32.xlu1 %v188_v16, %s2376_s18 }
 0x1ea   :  { %v284_v37 = vpop.permute.xlu1 %283 }
 0x1eb   :  { %v286_v38 = vadd.f32 %v284_v37, %v276_v36 }
 0x1ed   :  { %2230 = vtanh.f32 %v286_v38 }
 0x1f7   :  { %v2231_v39 = vpop.eup %2230 }
 0x1f8   :  { %289 = vrot.lane.b32.xlu0 %v2231_v39, %s2375_s16 }
 0x1fb   :  { %v2517_v40 = vpop.permute.xlu1 %296 }
 0x1fc   :  { %vm298_vm3 = vcmp.eq.s32.totalorder %v2517_v40, 1 }
 0x1fd   :  { %v303_v41 = vsel %vm298_vm3, %v286_v38, %v274_v35 }
 0x1fe   :  { %310 = vrot.lane.b32.xlu1 %v303_v41, %s2377_s0 }
 0x1ff   :  { %v300_v43 = vpop.permute.xlu1 %299 }
 0x26a   :  { %v290_v42 = vpop.permute.xlu0 %289 }
 0x26b   :  { %v292_v44 = vmul.f32 %v2229_v31, %v290_v42 }
 0x26d   :  { %v302_v45 = vsel %vm298_vm3, %v292_v44, %v300_v43 }
 0x26e   :  { %305 = vrot.lane.b32.xlu0 %v302_v45, %s2376_s18 }
 0x270   :  { %v311_v46 = vpop.permute.xlu1 %310 }
 0x271   :  { %313 = vst.msk [vmem:[#allocation5] sm:$0xff] %vm66_vm0, %v311_v46 }
 0x278   :  { %v316_v47 = vld [vmem:[#allocation5] sm:$0xff] }
 0x279   :  { %401 = vrot.lane.b32.xlu1 %v316_v47, %s2375_s16 }
 0x27d   :  { %424 = vperm.xlu1 %2222, %v422_v48  }
 0x2e0   :  { %v306_v49 = vpop.permute.xlu0 %305 }
 0x2e1   :  { %308 = vst.msk [vmem:[#allocation4] sm:$0xff] %vm66_vm0, %v306_v49  ;;  %314 = vst.msk [vmem:[#allocation3] sm:$0xff] %vm66_vm0, %v306_v49 }
 0x2e8   :  { %v315_v50 = vld [vmem:[#allocation4] sm:$0xff] }
 0x2e9   :  { %1994 = vmatmul.mubr.msk.f32.vlgmr.msra.gmra.mrb[2].mxu1 %vm66_vm0, %v315_v50  ;;  %427 = vrot.lane.b32.xlu1 %v315_v50, %s2376_s18 }
 0x2ea   :  { %2151 = vmatpush3.bf16.msra.mxu1 %v2461_v9  ;;  %2015 = vmatprep.mubr.msk.f32.mxu1 %vm2372_vm1, %v2373_v1 }
 0x2eb   :  { %2152 = vmatprep.subr.bf16.mxu1 %v2371_v0  ;;  %v402_v62 = vpop.permute.xlu1 %401 }
 0x2ee   :  { %2154 = vmatpush3.bf16.msra.mxu1 %v2474_v14 }
 0x2ef   :  { %2161 = vmatprep.subr.bf16.mxu1 %v2371_v0 }
 0x2fc   :  { %v2544_v63 = vpop.permute.xlu1 %424 }
 0x2fd   :  { %vm426_vm5 = vcmp.eq.s32.totalorder %v2544_v63, 1 }
 0x35b   :  { %v428_v10 = vpop.permute.xlu1 %427 }
 0x3bc   :  { %v388_v52 = vpop.f32.mrb[2].mxu1 }
 0x3bd   :  { %v392_v53 = vadd.f32 %v388_v52, %v157_v51  ;;  %v1995_v54 = vpop.f32.mrb[3].mxu1  ;;  %v680_v52 = vsel %vm679_vm8, 1, %v2374_v24 }
 0x3bf   :  { %2232 = vtanh.f32 %v392_v53  ;;  %v1849_v56 = vmul.f32 -1.442695, %v392_v53 }
 0x3c1   :  { %2234 = vpow2.f32 %v1849_v56 }
 0x3c9   :  { %v2233_v55 = vpop.eup %2232 }
 0x3ca   :  { %406 = vrot.lane.b32.xlu0 %v2233_v55, %s2375_s16 }
 0x3cb   :  { %v2235_v57 = vpop.eup %2234 }
 0x3cc   :  { %v396_v58 = vadd.f32 1.0, %v2235_v57  ;;  %v167_v57 = vadd.f32 %v1970_v23, %v2498_v17 }
 0x3ce   :  { %2236 = vrcp.f32 %v396_v58 }
 0x3d8   :  { %v2237_v59 = vpop.eup %2236 }
 0x3d9   :  { %v404_v2 = vmul.f32 %v2237_v59, %v402_v62 }
 0x43c   :  { %v407_v60 = vpop.permute.xlu0 %406 }
 0x43d   :  { %v409_v61 = vmul.f32 %v2237_v59, %v407_v60 }
 0x43f   :  { %411 = vrot.lane.b32.xlu0 %v409_v61, %s2375_s16 }
 0x4b1   :  { %v412_v3 = vpop.permute.xlu0 %411 }
 0x4b2   :  { %v414_v4 = vadd.f32 %v412_v3, %v404_v2 }
 0x4b4   :  { %2238 = vtanh.f32 %v414_v4  ;;  %v431_v5 = vsel %vm426_vm5, %v414_v4, %v402_v62 }
 0x4b5   :  { %438 = vrot.lane.b32.xlu1 %v431_v5, %s2377_s0 }
 0x4be   :  { %v2239_v6 = vpop.eup %2238 }
 0x4bf   :  { %417 = vrot.lane.b32.xlu0 %v2239_v6, %s2375_s16 }
 0x527   :  { %v439_v11 = vpop.permute.xlu1 %438 }
 0x528   :  { %441 = vst.msk [vmem:[#allocation5] sm:$0xff] %vm66_vm0, %v439_v11 }
 0x52f   :  { %v445_v15 = vld [vmem:[#allocation5] sm:$0xff] }
 0x530   :  { %530 = vrot.lane.b32.xlu1 %v445_v15, %s2375_s16 }
 0x531   :  { %v418_v16 = vpop.permute.xlu0 %417 }
 0x532   :  { %v420_v19 = vmul.f32 %v2237_v59, %v418_v16  ;;  %v960_v16 = vld [vmem:[%s2868_s5] sm:$0xff] }
 0x534   :  { %553 = vperm.xlu1 %2222, %v551_v18   ;;  %v430_v20 = vsel %vm426_vm5, %v420_v19, %v428_v10  ;;  %v961_v18 = vld [vmem:[%s2868_s5 + $0x8] sm:$0xff] }
 0x535   :  { %433 = vrot.lane.b32.xlu0 %v430_v20, %s2376_s18  ;;  %v2167_v19 = vpack.c.bf16 %v961_v18, %v960_v16 }
 0x5a2   :  { %v531_v41 = vpop.permute.xlu1 %530 }
 0x5a7   :  { %v434_v21 = vpop.permute.xlu0 %433 }
 0x5a8   :  { %436 = vst.msk [vmem:[#allocation4] sm:$0xff] %vm66_vm0, %v434_v21  ;;  %443 = vst.msk [vmem:[#allocation3 + $0x8] sm:$0xff] %vm66_vm0, %v434_v21 }
 0x5af   :  { %v444_v22 = vld [vmem:[#allocation4] sm:$0xff] }
 0x5b0   :  { %2005 = vmatmul.mubr.msk.f32.vlgmr.msra.gmra.mrb[6].mxu0 %vm66_vm0, %v444_v22  ;;  %556 = vrot.lane.b32.xlu1 %v444_v22, %s2376_s18  ;;  %v809_v22 = vsel %vm808_vm10, 1, %v2374_v24 }
 0x5b1   :  { %2157 = vmatpush3.bf16.msra.mxu0 %v2461_v9  ;;  %2026 = vmatprep.mubr.msk.f32.mxu0 %vm2372_vm1, %v2373_v1 }
 0x5b2   :  { %2158 = vmatprep.subr.bf16.mxu0 %v2371_v0 }
 0x5b3   :  { %v2592_v42 = vpop.permute.xlu1 %553 }
 0x5b4   :  { %vm555_vm7 = vcmp.eq.s32.totalorder %v2592_v42, 1 }
 0x5b5   :  { %2160 = vmatpush3.bf16.msra.mxu0 %v2474_v14 }
 0x5b6   :  { %2168 = vmatprep.subr.bf16.mxu0 %v2167_v19 }
 0x622   :  { %v557_v48 = vpop.permute.xlu1 %556 }
 0x683   :  { %v517_v29 = vpop.f32.mrb[6].mxu0 }
 0x684   :  { %v521_v31 = vadd.f32 %v517_v29, %v162_v28  ;;  %v2006_v32 = vpop.f32.mrb[7].mxu0  ;;  %v962_v29 = vld [vmem:[%s2868_s5 + $0x10] sm:$0xff] }
 0x686   :  { %2240 = vtanh.f32 %v521_v31  ;;  %v1851_v34 = vmul.f32 -1.442695, %v521_v31  ;;  %v963_v31 = vld [vmem:[%s2868_s5 + $0x18] sm:$0xff] }
 0x687   :  { %v2171_v32 = vpack.c.bf16 %v963_v31, %v962_v29 }
 0x688   :  { %2242 = vpow2.f32 %v1851_v34  ;;  %v969_v34 = vld [vmem:[#allocation3] sm:$0xff] }
 0x690   :  { %v2241_v33 = vpop.eup %2240 }
 0x691   :  { %535 = vrot.lane.b32.xlu0 %v2241_v33, %s2375_s16 }
 0x692   :  { %v2243_v35 = vpop.eup %2242 }
 0x693   :  { %v525_v36 = vadd.f32 1.0, %v2243_v35  ;;  %v970_v35 = vld [vmem:[#allocation3 + $0x8] sm:$0xff] }
 0x695   :  { %2244 = vrcp.f32 %v525_v36 }
 0x69f   :  { %v2245_v37 = vpop.eup %2244 }
 0x6a0   :  { %v533_v43 = vmul.f32 %v2245_v37, %v531_v41 }
 0x703   :  { %v536_v38 = vpop.permute.xlu0 %535 }
 0x704   :  { %v538_v39 = vmul.f32 %v2245_v37, %v536_v38  ;;  %v172_v38 = vadd.f32 %v2498_v17, %v2587_v27 }
 0x706   :  { %540 = vrot.lane.b32.xlu0 %v538_v39, %s2375_s16 }
 0x778   :  { %v541_v44 = vpop.permute.xlu0 %540 }
 0x779   :  { %v543_v45 = vadd.f32 %v541_v44, %v533_v43 }
 0x77b   :  { %2246 = vtanh.f32 %v543_v45  ;;  %v560_v46 = vsel %vm555_vm7, %v543_v45, %v531_v41 }
 0x77c   :  { %567 = vrot.lane.b32.xlu1 %v560_v46, %s2377_s0 }
 0x785   :  { %v2247_v47 = vpop.eup %2246 }
 0x786   :  { %546 = vrot.lane.b32.xlu0 %v2247_v47, %s2375_s16 }
 0x7ee   :  { %v568_v49 = vpop.permute.xlu1 %567 }
 0x7ef   :  { %570 = vst.msk [vmem:[#allocation5] sm:$0xff] %vm66_vm0, %v568_v49 }
 0x7f6   :  { %v574_v50 = vld [vmem:[#allocation5] sm:$0xff] }
 0x7f7   :  { %659 = vrot.lane.b32.xlu1 %v574_v50, %s2375_s16 }
 0x7f8   :  { %v547_v51 = vpop.permute.xlu0 %546 }
 0x7f9   :  { %v549_v53 = vmul.f32 %v2245_v37, %v547_v51 }
 0x7fb   :  { %682 = vperm.xlu1 %2222, %v680_v52   ;;  %v559_v54 = vsel %vm555_vm7, %v549_v53, %v557_v48 }
 0x7fc   :  { %562 = vrot.lane.b32.xlu0 %v559_v54, %s2376_s18 }
 0x86e   :  { %v563_v55 = vpop.permute.xlu0 %562 }
 0x86f   :  { %565 = vst.msk [vmem:[#allocation4] sm:$0xff] %vm66_vm0, %v563_v55  ;;  %572 = vst.msk [vmem:[#allocation3 + $0x10] sm:$0xff] %vm66_vm0, %v563_v55 }
 0x876   :  { %v573_v56 = vld [vmem:[#allocation4] sm:$0xff] }
 0x877   :  { %2016 = vmatmul.mubr.msk.f32.vlgmr.msra.gmra.mrb[4].mxu1 %vm66_vm0, %v573_v56  ;;  %685 = vrot.lane.b32.xlu1 %v573_v56, %s2376_s18  ;;  %v971_v36 = vld [vmem:[#allocation3 + $0x10] sm:$0xff] }
 0x878   :  { %2163 = vmatpush3.bf16.msra.mxu1 %v2461_v9  ;;  %2037 = vmatprep.mubr.msk.f32.mxu1 %vm2372_vm1, %v2373_v1 }
 0x879   :  { %2164 = vmatprep.subr.bf16.mxu1 %v2371_v0 }
 0x87c   :  { %2166 = vmatpush3.bf16.msra.mxu1 %v2474_v14  ;;  %v660_v14 = vpop.permute.xlu1 %659 }
 0x87d   :  { %2175 = vmatprep.subr.bf16.mxu1 %v2371_v0 }
 0x880   :  { %v2619_v6 = vpop.permute.xlu1 %682 }
 0x881   :  { %vm684_vm9 = vcmp.eq.s32.totalorder %v2619_v6, 1 }
 0x8e9   :  { %v686_v13 = vpop.permute.xlu1 %685 }
 0x94a   :  { %v646_v58 = vpop.f32.mrb[4].mxu1 }
 0x94b   :  { %v650_v59 = vadd.f32 %v646_v58, %v167_v57  ;;  %v2017_v60 = vpop.f32.mrb[5].mxu1 }
 0x94d   :  { %2248 = vtanh.f32 %v650_v59  ;;  %v1853_v62 = vmul.f32 -1.442695, %v650_v59 }
 0x94f   :  { %2250 = vpow2.f32 %v1853_v62 }
 0x957   :  { %v2249_v61 = vpop.eup %2248 }
 0x958   :  { %664 = vrot.lane.b32.xlu0 %v2249_v61, %s2375_s16 }
 0x959   :  { %v2251_v9 = vpop.eup %2250 }
 0x95a   :  { %v654_v2 = vadd.f32 1.0, %v2251_v9 }
 0x95c   :  { %2252 = vrcp.f32 %v654_v2 }
 0x966   :  { %v2253_v3 = vpop.eup %2252 }
 0x967   :  { %v662_v7 = vmul.f32 %v2253_v3, %v660_v14 }
 0x9ca   :  { %v665_v4 = vpop.permute.xlu0 %664 }
 0x9cb   :  { %v667_v5 = vmul.f32 %v2253_v3, %v665_v4 }
 0x9cd   :  { %669 = vrot.lane.b32.xlu0 %v667_v5, %s2375_s16 }
 0xa3f   :  { %v670_v8 = vpop.permute.xlu0 %669 }
 0xa40   :  { %v672_v10 = vadd.f32 %v670_v8, %v662_v7 }
 0xa42   :  { %2254 = vtanh.f32 %v672_v10  ;;  %v689_v11 = vsel %vm684_vm9, %v672_v10, %v660_v14 }
 0xa43   :  { %696 = vrot.lane.b32.xlu1 %v689_v11, %s2377_s0 }
 0xa4c   :  { %v2255_v12 = vpop.eup %2254 }
 0xa4d   :  { %675 = vrot.lane.b32.xlu0 %v2255_v12, %s2375_s16 }
 0xab5   :  { %v697_v15 = vpop.permute.xlu1 %696 }
 0xab6   :  { %699 = vst.msk [vmem:[#allocation5] sm:$0xff] %vm66_vm0, %v697_v15 }
 0xabd   :  { %v703_v20 = vld [vmem:[#allocation5] sm:$0xff] }
 0xabe   :  { %788 = vrot.lane.b32.xlu1 %v703_v20, %s2375_s16 }
 0xabf   :  { %v676_v21 = vpop.permute.xlu0 %675 }
 0xac0   :  { %v678_v23 = vmul.f32 %v2253_v3, %v676_v21  ;;  %v938_v3 = vsel %vm937_vm12, 1, %v2374_v24  ;;  %v177_v24 = vadd.f32 %v2585_v26, %v2498_v17 }
 0xac2   :  { %811 = vperm.xlu1 %2222, %v809_v22   ;;  %v688_v25 = vsel %vm684_vm9, %v678_v23, %v686_v13 }
 0xac3   :  { %691 = vrot.lane.b32.xlu0 %v688_v25, %s2376_s18 }
 0xb30   :  { %v789_v54 = vpop.permute.xlu1 %788 }
 0xb35   :  { %v692_v28 = vpop.permute.xlu0 %691 }
 0xb36   :  { %694 = vst.msk [vmem:[#allocation4] sm:$0xff] %vm66_vm0, %v692_v28  ;;  %701 = vst.msk [vmem:[#allocation3 + $0x18] sm:$0xff] %vm66_vm0, %v692_v28 }
 0xb3d   :  { %v702_v33 = vld [vmem:[#allocation4] sm:$0xff]  ;;  %v972_v37 = vld [vmem:[#allocation3 + $0x18] sm:$0xff] }
 0xb3e   :  { %2027 = vmatmul.mubr.msk.f32.vlgmr.msra.gmra.mrb[8].mxu0 %vm66_vm0, %v702_v33  ;;  %814 = vrot.lane.b32.xlu1 %v702_v33, %s2376_s18  ;;  %v965_v33 = vld [vmem:[#allocation6 + $0x8] sm:$0xff] }
 0xb3f   :  { %2170 = vmatpush3.bf16.msra.mxu0 %v2167_v19  ;;  %2048 = vmatprep.mubr.msk.f32.mxu0 %vm66_vm0, %v969_v34 }
 0xb40   :  { %2172 = vmatprep.subr.bf16.mxu0 %v2171_v32 }
 0xb41   :  { %v2666_v55 = vpop.permute.xlu1 %811 }
 0xb42   :  { %vm813_vm11 = vcmp.eq.s32.totalorder %v2666_v55, 1 }
 0xb43   :  { %2174 = vmatpush3.bf16.msra.mxu0 %v2171_v32  ;;  %v964_v32 = vld [vmem:[#allocation6] sm:$0xff] }
 0xb44   :  { %2181 = vmatprep.subr.bf16.mxu0 %v2371_v0  ;;  %v2701_v34 = vpack.c.bf16 %v965_v33, %v964_v32 }
 0xb46   :  { %2049 = vmatmul.mubr.msk.f32.vlgmr.msra.gmra.mrb[10].mxu0 %vm66_vm0, %v970_v35  ;;  %v966_v35 = vld [vmem:[#allocation6 + $0x10] sm:$0xff] }
 0xb47   :  { %2051 = vmatprep.mubr.msk.f32.mxu0 %vm66_vm0, %v971_v36  ;;  %v967_v36 = vld [vmem:[#allocation6 + $0x18] sm:$0xff]  ;;  %2183 = vmatpush3.bf16.msra.mxu0 %v2701_v34 }
 0xb48   :  { %2184 = vmatprep.subr.bf16.mxu0 %v2371_v0 }
 0xb4a   :  { %2052 = vmatmul.mubr.msk.f32.gmra.mrb[12].mxu0 %vm66_vm0, %v972_v37  ;;  %v2704_v37 = vpack.c.bf16 %v967_v36, %v966_v35 }
 0xb4c   :  { %2186 = vmatpush3.bf16.msra.mxu0 %v2704_v37 }
 0xb4d   :  { %2193 = vmatprep.subr.bf16.mxu0 %v2371_v0 }
 0xbb0   :  { %v815_v61 = vpop.permute.xlu1 %814 }
 0xc11   :  { %v775_v39 = vpop.f32.mrb[8].mxu0 }
 0xc12   :  { %v779_v41 = vadd.f32 %v775_v39, %v172_v38  ;;  %v2028_v43 = vpop.f32.mrb[9].mxu0 }
 0xc14   :  { %2256 = vtanh.f32 %v779_v41  ;;  %v1855_v49 = vmul.f32 -1.442695, %v779_v41 }
 0xc16   :  { %2258 = vpow2.f32 %v1855_v49 }
 0xc19   :  { %v2656_v44 = vpop.f32.mrb[10].mxu0 }
 0xc1a   :  { %v2658_v45 = vpop.f32.mrb[11].mxu0 }
 0xc1d   :  { %v2660_v46 = vpop.f32.mrb[12].mxu0 }
 0xc1e   :  { %v2257_v47 = vpop.eup %2256  ;;  %v2662_v48 = vpop.f32.mrb[13].mxu0 }
 0xc1f   :  { %793 = vrot.lane.b32.xlu0 %v2257_v47, %s2375_s16 }
 0xc20   :  { %v2259_v50 = vpop.eup %2258 }
 0xc21   :  { %v783_v51 = vadd.f32 1.0, %v2259_v50 }
 0xc23   :  { %2260 = vrcp.f32 %v783_v51  ;;  %v2734_v51 = vld [vmem:[%s2870_s7] ss:$0 sm:$0xff]  ;;  %s2378_s7 = smov [#allocation9]  }
 0xc24   :  { %v1071_v40 = vadd.f32 %v2656_v44, %v2734_v51  ;;  %v1076_v63 = vadd.f32 %v2734_v51, %v2662_v48  ;;  %v1081_v42 = vadd.f32 %v2660_v46, %v2734_v51  ;;  %s1830_s12 = sshll.u32 %s2378_s7, 4  ;;  %s1831_s12 = int_to_ptr.vmem [resolvable:$true] %s1830_s12 }
 0xc25   :  { %s2342_s13 = scalar_lea.vmem %s1831_s12, 128  ;;  %p2347_p9 = scmp.lt.s32.totalorder %s1831_s12, %s1831_s12 }
 0xc26   :  { %p2343_p8 = scmp.ne.s32.totalorder %s1831_s12, %s2342_s13  ;;  %p2348_p10 = scmp.lt.s32.totalorder %s2342_s13, %s2342_s13 }
 0xc28   :  { %p2349_p11 = por %p2348_p10, %p2347_p9 }
 0xc2a   :  { %p2350_p12 = pnand %p2349_p11, %p2343_p8 }
 0xc2d   :  { %v2261_v27 = vpop.eup %2260 }
 0xc2e   :  { %v791_v56 = vmul.f32 %v2261_v27, %v789_v54 }
 0xc91   :  { %v794_v52 = vpop.permute.xlu0 %793 }
 0xc92   :  { %v796_v53 = vmul.f32 %v2261_v27, %v794_v52 }
 0xc94   :  { %798 = vrot.lane.b32.xlu0 %v796_v53, %s2375_s16 }
 0xd06   :  { %v799_v57 = vpop.permute.xlu0 %798 }
 0xd07   :  { %v801_v58 = vadd.f32 %v799_v57, %v791_v56 }
 0xd09   :  { %2262 = vtanh.f32 %v801_v58  ;;  %v818_v59 = vsel %vm813_vm11, %v801_v58, %v789_v54 }
 0xd0a   :  { %825 = vrot.lane.b32.xlu1 %v818_v59, %s2377_s0 }
 0xd13   :  { %v2263_v60 = vpop.eup %2262 }
 0xd14   :  { %804 = vrot.lane.b32.xlu0 %v2263_v60, %s2375_s16 }
 0xd7c   :  { %v826_v62 = vpop.permute.xlu1 %825 }
 0xd7d   :  { %828 = vst.msk [vmem:[#allocation5] sm:$0xff] %vm66_vm0, %v826_v62 }
 0xd84   :  { %v832_v9 = vld [vmem:[#allocation5] sm:$0xff] }
 0xd85   :  { %917 = vrot.lane.b32.xlu1 %v832_v9, %s2375_s16 }
 0xd86   :  { %v805_v2 = vpop.permute.xlu0 %804 }
 0xd87   :  { %v807_v4 = vmul.f32 %v2261_v27, %v805_v2  ;;  %v1066_v27 = vadd.f32 %v2734_v51, %v2658_v45 }
 0xd89   :  { %940 = vperm.xlu1 %2222, %v938_v3   ;;  %v817_v5 = vsel %vm813_vm11, %v807_v4, %v815_v61 }
 0xd8a   :  { %820 = vrot.lane.b32.xlu0 %v817_v5, %s2376_s18 }
 0xdf7   :  { %v918_v21 = vpop.permute.xlu1 %917 }
 0xdfc   :  { %v821_v14 = vpop.permute.xlu0 %820 }
 0xdfd   :  { %823 = vst.msk [vmem:[#allocation4] sm:$0xff] %vm66_vm0, %v821_v14  ;;  %830 = vst.msk [vmem:[#allocation3 + $0x20] sm:$0xff] %vm66_vm0, %v821_v14 }
 0xe04   :  { %v831_v7 = vld [vmem:[#allocation4] sm:$0xff]  ;;  %v973_v30 = vld [vmem:[#allocation3 + $0x20] sm:$0xff] }
 0xe05   :  { %2038 = vmatmul.mubr.msk.f32.vlgmr.msra.gmra.mrb[6].mxu1 %vm66_vm0, %v831_v7  ;;  %2054 = vmatprep.mubr.msk.f32.mxu0 %vm66_vm0, %v973_v30 }
 0xe06   :  { %943 = vrot.lane.b32.xlu1 %v831_v7, %s2376_s18  ;;  %2065 = vmatprep.mubr.msk.f32.mxu1 %vm2372_vm1, %v2373_v1 }
 0xe07   :  { %2177 = vmatpush3.bf16.msra.mxu1 %v2701_v34 }
 0xe08   :  { %v2691_v22 = vpop.permute.xlu1 %940  ;;  %2178 = vmatprep.subr.bf16.mxu1 %v2371_v0 }
 0xe09   :  { %vm942_vm13 = vcmp.eq.s32.totalorder %v2691_v22, 1 }
 0xe0b   :  { %2180 = vmatpush3.bf16.msra.mxu1 %v2704_v37 }
 0xe0c   :  { %2187 = vmatprep.subr.bf16.mxu1 %v2371_v0 }
 0xe78   :  { %v944_v29 = vpop.permute.xlu1 %943 }
 0xed8   :  { %v904_v8 = vpop.f32.mrb[6].mxu1 }
 0xed9   :  { %v908_v10 = vadd.f32 %v904_v8, %v177_v24  ;;  %v2039_v11 = vpop.f32.mrb[7].mxu1 }
 0xedb   :  { %2264 = vtanh.f32 %v908_v10  ;;  %v1857_v13 = vmul.f32 -1.442695, %v908_v10 }
 0xedd   :  { %2266 = vpow2.f32 %v1857_v13 }
 0xee5   :  { %v2265_v12 = vpop.eup %2264 }
 0xee6   :  { %922 = vrot.lane.b32.xlu0 %v2265_v12, %s2375_s16 }
 0xee7   :  { %v2267_v15 = vpop.eup %2266 }
 0xee8   :  { %v912_v16 = vadd.f32 1.0, %v2267_v15 }
 0xeea   :  { %2268 = vrcp.f32 %v912_v16 }
 0xef4   :  { %v2269_v18 = vpop.eup %2268 }
 0xef5   :  { %v920_v17 = vmul.f32 %v2269_v18, %v918_v21 }
 0xf58   :  { %v923_v19 = vpop.permute.xlu0 %922 }
 0xf59   :  { %v925_v20 = vmul.f32 %v2269_v18, %v923_v19 }
 0xf5b   :  { %927 = vrot.lane.b32.xlu0 %v925_v20, %s2375_s16 }
 0xfcd   :  { %v928_v26 = vpop.permute.xlu0 %927 }
 0xfce   :  { %v930_v23 = vadd.f32 %v928_v26, %v920_v17 }
 0xfd0   :  { %2270 = vtanh.f32 %v930_v23  ;;  %v947_v25 = vsel %vm942_vm13, %v930_v23, %v918_v21 }
 0xfd1   :  { %954 = vrot.lane.b32.xlu1 %v947_v25, %s2377_s0 }
 0xfda   :  { %v2271_v28 = vpop.eup %2270 }
 0xfdb   :  { %933 = vrot.lane.b32.xlu0 %v2271_v28, %s2375_s16 }
0x1043   :  { %v955_v31 = vpop.permute.xlu1 %954 }
0x1044   :  { %957 = vst.msk [vmem:[#allocation5] sm:$0xff] %vm66_vm0, %v955_v31 }
0x1045   :  { %1101 = vst.msk [vmem:[#allocation5] sm:$0xff] %vm66_vm0, %v2373_v1 }
0x104c   :  { %v1103_v39 = vld [vmem:[#allocation5] sm:$0xff] }
0x104d   :  { %v934_v38 = vpop.permute.xlu0 %933  ;;  %1187 = vrot.lane.b32.xlu1 %v1103_v39, %s2375_s16 }
0x104e   :  { %v936_v41 = vmul.f32 %v2269_v18, %v934_v38 }
0x1050   :  { %v946_v43 = vsel %vm942_vm13, %v936_v41, %v944_v29 }
0x1051   :  { %949 = vrot.lane.b32.xlu0 %v946_v43, %s2376_s18 }
0x10bf   :  { %v1188_v45 = vpop.permute.xlu1 %1187 }
0x10c3   :  { %v950_v47 = vpop.permute.xlu0 %949 }
0x10c4   :  { %952 = vst.msk [vmem:[#allocation4] sm:$0xff] %vm66_vm0, %v950_v47  ;;  %959 = vst.msk [vmem:[#allocation3 + $0x28] sm:$0xff] %vm66_vm0, %v950_v47 }
0x10c5   :  { %1100 = vst.msk [vmem:[#allocation4] sm:$0xff] %vm66_vm0, %v2373_v1 }
0x10cb   :  { %v974_v49 = vld [vmem:[#allocation3 + $0x28] sm:$0xff] }
0x10cc   :  { %2055 = vmatmul.mubr.msk.f32.gmra.mrb[14].mxu0 %vm66_vm0, %v974_v49  ;;  %v1102_v50 = vld [vmem:[#allocation4] sm:$0xff] }
0x10cd   :  { %2066 = vmatmul.mubr.msk.f32.vlgmr.msra.gmra.mrb[8].mxu1 %vm66_vm0, %v1102_v50  ;;  %2076 = vmatprep.mubr.msk.f32.mxu0 %vm2372_vm1, %v2373_v1 }
0x10ce   :  { %2189 = vmatpush3.bf16.msra.mxu1 %v2701_v34  ;;  %2087 = vmatprep.mubr.msk.f32.mxu1 %vm2372_vm1, %v2373_v1 }
0x10cf   :  { %2190 = vmatprep.subr.bf16.mxu1 %v2371_v0 }
0x10d2   :  { %2192 = vmatpush3.bf16.msra.mxu1 %v2704_v37 }
0x10d3   :  { %2199 = vmatprep.subr.bf16.mxu1 %v2371_v0 }
0x119f   :  { %v2738_v52 = vpop.f32.mrb[14].mxu0 }
0x11a0   :  { %v2740_v53 = vpop.f32.mrb[15].mxu0  ;;  %v1174_v54 = vpop.f32.mrb[8].mxu1 }
0x11a1   :  { %v1178_v56 = vadd.f32 %v1174_v54, %v1066_v27  ;;  %v2067_v57 = vpop.f32.mrb[9].mxu1 }
0x11a3   :  { %2272 = vtanh.f32 %v1178_v56  ;;  %v1866_v59 = vmul.f32 -1.442695, %v1178_v56 }
0x11a5   :  { %2274 = vpow2.f32 %v1866_v59 }
0x11ad   :  { %v2273_v58 = vpop.eup %2272 }
0x11ae   :  { %1192 = vrot.lane.b32.xlu0 %v2273_v58, %s2375_s16 }
0x11af   :  { %v2275_v60 = vpop.eup %2274 }
0x11b0   :  { %v1182_v61 = vadd.f32 1.0, %v2275_v60 }
0x11b2   :  { %2276 = vrcp.f32 %v1182_v61 }
0x11bc   :  { %v2277_v62 = vpop.eup %2276 }
0x11bd   :  { %v1190_v3 = vmul.f32 %v2277_v62, %v1188_v45 }
0x1220   :  { %v1193_v9 = vpop.permute.xlu0 %1192 }
0x1221   :  { %v1195_v2 = vmul.f32 %v2277_v62, %v1193_v9 }
0x1223   :  { %1197 = vrot.lane.b32.xlu0 %v1195_v2, %s2375_s16 }
0x1227   :  { %1207 = vrot.lane.b32.xlu0 %v1102_v50, %s2376_s18 }
0x1295   :  { %v1198_v4 = vpop.permute.xlu0 %1197 }
0x1296   :  { %v1200_v5 = vadd.f32 %v1198_v4, %v1190_v3 }
0x1298   :  { %2278 = vtanh.f32 %v1200_v5  ;;  %v1211_v14 = vsel %vm298_vm3, %v1200_v5, %v1188_v45 }
0x1299   :  { %1218 = vrot.lane.b32.xlu0 %v1211_v14, %s2377_s0  ;;  %v1208_v30 = vpop.permute.xlu0 %1207 }
0x12a2   :  { %v2279_v7 = vpop.eup %2278 }
0x12a3   :  { %1203 = vrot.lane.b32.xlu1 %v2279_v7, %s2375_s16 }
0x130b   :  { %v1219_v24 = vpop.permute.xlu0 %1218 }
0x130c   :  { %1221 = vst.msk [vmem:[#allocation5] sm:$0xff] %vm66_vm0, %v1219_v24 }
0x1313   :  { %v1223_v8 = vld [vmem:[#allocation5] sm:$0xff] }
0x1314   :  { %1307 = vrot.lane.b32.xlu0 %v1223_v8, %s2375_s16 }
0x1315   :  { %v1204_v10 = vpop.permute.xlu1 %1203 }
0x1316   :  { %v1206_v11 = vmul.f32 %v2277_v62, %v1204_v10 }
0x1318   :  { %v1210_v12 = vsel %vm298_vm3, %v1206_v11, %v1208_v30 }
0x1319   :  { %1213 = vrot.lane.b32.xlu1 %v1210_v12, %s2376_s18 }
0x1386   :  { %v1308_v44 = vpop.permute.xlu0 %1307 }
0x138b   :  { %v1214_v13 = vpop.permute.xlu1 %1213 }
0x138c   :  { %1216 = vst.msk [vmem:[#allocation4] sm:$0xff] %vm66_vm0, %v1214_v13 }
0x1393   :  { %v1222_v15 = vld [vmem:[#allocation4] sm:$0xff] }
0x1394   :  { %2077 = vmatmul.mubr.msk.f32.vlgmr.msra.gmra.mrb[16].mxu0 %vm66_vm0, %v1222_v15 }
0x1395   :  { %2195 = vmatpush3.bf16.msra.mxu0 %v2701_v34  ;;  %2098 = vmatprep.mubr.msk.f32.mxu0 %vm2372_vm1, %v2373_v1 }
0x1396   :  { %2196 = vmatprep.subr.bf16.mxu0 %v2371_v0 }
0x1399   :  { %2198 = vmatpush3.bf16.msra.mxu0 %v2704_v37 }
0x139a   :  { %2205 = vmatprep.subr.bf16.mxu0 %v2371_v0 }
0x1467   :  { %v1294_v16 = vpop.f32.mrb[16].mxu0 }
0x1468   :  { %v1298_v18 = vadd.f32 %v1294_v16, %v1071_v40  ;;  %v2078_v19 = vpop.f32.mrb[17].mxu0 }
0x146a   :  { %2280 = vtanh.f32 %v1298_v18  ;;  %v1868_v21 = vmul.f32 -1.442695, %v1298_v18 }
0x146c   :  { %2282 = vpow2.f32 %v1868_v21 }
0x1474   :  { %v2281_v20 = vpop.eup %2280 }
0x1475   :  { %1312 = vrot.lane.b32.xlu1 %v2281_v20, %s2375_s16 }
0x1476   :  { %v2283_v17 = vpop.eup %2282 }
0x1477   :  { %v1302_v26 = vadd.f32 1.0, %v2283_v17 }
0x1479   :  { %2284 = vrcp.f32 %v1302_v26 }
0x1483   :  { %v2285_v23 = vpop.eup %2284 }
0x1484   :  { %v1310_v29 = vmul.f32 %v2285_v23, %v1308_v44 }
0x14e7   :  { %v1313_v25 = vpop.permute.xlu1 %1312 }
0x14e8   :  { %v1315_v28 = vmul.f32 %v2285_v23, %v1313_v25 }
0x14ea   :  { %1317 = vrot.lane.b32.xlu1 %v1315_v28, %s2375_s16 }
0x14ee   :  { %1327 = vrot.lane.b32.xlu1 %v1222_v15, %s2376_s18 }
0x155c   :  { %v1318_v31 = vpop.permute.xlu1 %1317 }
0x155d   :  { %v1320_v32 = vadd.f32 %v1318_v31, %v1310_v29 }
0x155f   :  { %2286 = vtanh.f32 %v1320_v32  ;;  %v1331_v33 = vsel %vm426_vm5, %v1320_v32, %v1308_v44 }
0x1560   :  { %1338 = vrot.lane.b32.xlu1 %v1331_v33, %s2377_s0  ;;  %v1328_v36 = vpop.permute.xlu1 %1327 }
0x1569   :  { %v2287_v35 = vpop.eup %2286 }
0x156a   :  { %1323 = vrot.lane.b32.xlu0 %v2287_v35, %s2375_s16 }
0x15d2   :  { %v1339_v38 = vpop.permute.xlu1 %1338 }
0x15d3   :  { %1341 = vst.msk [vmem:[#allocation5] sm:$0xff] %vm66_vm0, %v1339_v38 }
0x15da   :  { %v1343_v39 = vld [vmem:[#allocation5] sm:$0xff] }
0x15db   :  { %1427 = vrot.lane.b32.xlu1 %v1343_v39, %s2375_s16 }
0x15dc   :  { %v1324_v41 = vpop.permute.xlu0 %1323 }
0x15dd   :  { %v1326_v43 = vmul.f32 %v2285_v23, %v1324_v41 }
0x15df   :  { %v1330_v47 = vsel %vm426_vm5, %v1326_v43, %v1328_v36  ;;  %v1086_v36 = vadd.f32 %v2734_v51, %v2740_v53 }
0x15e0   :  { %1333 = vrot.lane.b32.xlu0 %v1330_v47, %s2376_s18 }
0x164d   :  { %v1428_v48 = vpop.permute.xlu1 %1427 }
0x1652   :  { %v1334_v49 = vpop.permute.xlu0 %1333 }
0x1653   :  { %1336 = vst.msk [vmem:[#allocation4] sm:$0xff] %vm66_vm0, %v1334_v49 }
0x165a   :  { %v1342_v50 = vld [vmem:[#allocation4] sm:$0xff] }
0x165b   :  { %2088 = vmatmul.mubr.msk.f32.vlgmr.msra.gmra.mrb[10].mxu1 %vm66_vm0, %v1342_v50 }
0x165c   :  { %2201 = vmatpush3.bf16.msra.mxu1 %v2701_v34  ;;  %2109 = vmatprep.mubr.msk.f32.mxu1 %vm2372_vm1, %v2373_v1 }
0x165d   :  { %2202 = vmatprep.subr.bf16.mxu1 %v2371_v0 }
0x1660   :  { %2204 = vmatpush3.bf16.msra.mxu1 %v2704_v37 }
0x172e   :  { %v1414_v27 = vpop.f32.mrb[10].mxu1 }
0x172f   :  { %v1418_v54 = vadd.f32 %v1414_v27, %v1076_v63  ;;  %v2089_v56 = vpop.f32.mrb[11].mxu1 }
0x1731   :  { %2288 = vtanh.f32 %v1418_v54  ;;  %v1870_v58 = vmul.f32 -1.442695, %v1418_v54 }
0x1733   :  { %2290 = vpow2.f32 %v1870_v58 }
0x173b   :  { %v2289_v57 = vpop.eup %2288 }
0x173c   :  { %1432 = vrot.lane.b32.xlu0 %v2289_v57, %s2375_s16 }
0x173d   :  { %v2291_v59 = vpop.eup %2290 }
0x173e   :  { %v1422_v60 = vadd.f32 1.0, %v2291_v59 }
0x1740   :  { %2292 = vrcp.f32 %v1422_v60 }
0x174a   :  { %v2293_v61 = vpop.eup %2292 }
0x174b   :  { %v1430_v2 = vmul.f32 %v2293_v61, %v1428_v48 }
0x17ae   :  { %v1433_v62 = vpop.permute.xlu0 %1432 }
0x17af   :  { %v1435_v9 = vmul.f32 %v2293_v61, %v1433_v62 }
0x17b1   :  { %1437 = vrot.lane.b32.xlu0 %v1435_v9, %s2375_s16 }
0x17b5   :  { %1447 = vrot.lane.b32.xlu0 %v1342_v50, %s2376_s18 }
0x1823   :  { %v1438_v45 = vpop.permute.xlu0 %1437 }
0x1824   :  { %v1440_v3 = vadd.f32 %v1438_v45, %v1430_v2 }
0x1826   :  { %2294 = vtanh.f32 %v1440_v3  ;;  %v1451_v4 = vsel %vm555_vm7, %v1440_v3, %v1428_v48 }
0x1827   :  { %1458 = vrot.lane.b32.xlu0 %v1451_v4, %s2377_s0  ;;  %v1448_v14 = vpop.permute.xlu0 %1447  ;;  %v1091_v4 = vadd.f32 %v2738_v52, %v2734_v51 }
0x1830   :  { %v2295_v5 = vpop.eup %2294 }
0x1831   :  { %1443 = vrot.lane.b32.xlu1 %v2295_v5, %s2375_s16 }
0x1899   :  { %v1459_v7 = vpop.permute.xlu0 %1458 }
0x189a   :  { %1461 = vst.msk [vmem:[#allocation5] sm:$0xff] %vm66_vm0, %v1459_v7 }
0x18a1   :  { %v1463_v30 = vld [vmem:[#allocation5] sm:$0xff] }
0x18a2   :  { %1547 = vrot.lane.b32.xlu0 %v1463_v30, %s2375_s16 }
0x18a3   :  { %v1444_v24 = vpop.permute.xlu1 %1443 }
0x18a4   :  { %v1446_v8 = vmul.f32 %v2293_v61, %v1444_v24 }
0x18a6   :  { %v1450_v10 = vsel %vm555_vm7, %v1446_v8, %v1448_v14 }
0x18a7   :  { %1453 = vrot.lane.b32.xlu1 %v1450_v10, %s2376_s18 }
0x1914   :  { %v1548_v46 = vpop.permute.xlu0 %1547 }
0x1919   :  { %v1454_v11 = vpop.permute.xlu1 %1453 }
0x191a   :  { %1456 = vst.msk [vmem:[#allocation4] sm:$0xff] %vm66_vm0, %v1454_v11 }
0x1921   :  { %v1462_v12 = vld [vmem:[#allocation4] sm:$0xff] }
0x1922   :  { %2099 = vmatmul.mubr.msk.f32.vlgmr.msra.gmra.mrb[18].mxu0 %vm66_vm0, %v1462_v12 }
0x1923   :  { %2207 = vmatpush3.bf16.msra.mxu0 %v2701_v34  ;;  %2120 = vmatprep.mubr.msk.f32.mxu0 %vm2372_vm1, %v2373_v1 }
0x1924   :  { %2208 = vmatprep.subr.bf16.mxu0 %v2371_v0 }
0x1927   :  { %2210 = vmatpush3.bf16.msra.mxu0 %v2704_v37 }
0x19f5   :  { %v1534_v13 = vpop.f32.mrb[18].mxu0 }
0x19f6   :  { %v1538_v15 = vadd.f32 %v1534_v13, %v1081_v42  ;;  %v2100_v40 = vpop.f32.mrb[19].mxu0 }
0x19f8   :  { %2296 = vtanh.f32 %v1538_v15  ;;  %v1872_v18 = vmul.f32 -1.442695, %v1538_v15 }
0x19fa   :  { %2298 = vpow2.f32 %v1872_v18 }
0x1a02   :  { %v2297_v16 = vpop.eup %2296 }
0x1a03   :  { %1552 = vrot.lane.b32.xlu1 %v2297_v16, %s2375_s16 }
0x1a04   :  { %v2299_v34 = vpop.eup %2298 }
0x1a05   :  { %v1542_v19 = vadd.f32 1.0, %v2299_v34 }
0x1a07   :  { %2300 = vrcp.f32 %v1542_v19 }
0x1a11   :  { %v2301_v1 = vpop.eup %2300 }
0x1a12   :  { %v1550_v37 = vmul.f32 %v2301_v1, %v1548_v46 }
0x1a75   :  { %v1553_v20 = vpop.permute.xlu1 %1552 }
0x1a76   :  { %v1555_v0 = vmul.f32 %v2301_v1, %v1553_v20 }
0x1a78   :  { %1557 = vrot.lane.b32.xlu1 %v1555_v0, %s2375_s16 }
0x1a7c   :  { %1567 = vrot.lane.b32.xlu1 %v1462_v12, %s2376_s18 }
0x1aea   :  { %v1558_v21 = vpop.permute.xlu1 %1557 }
0x1aeb   :  { %v1560_v17 = vadd.f32 %v1558_v21, %v1550_v37 }
0x1aed   :  { %2302 = vtanh.f32 %v1560_v17  ;;  %v1571_v26 = vsel %vm684_vm9, %v1560_v17, %v1548_v46 }
0x1aee   :  { %1578 = vrot.lane.b32.xlu1 %v1571_v26, %s2377_s0  ;;  %v1568_v25 = vpop.permute.xlu1 %1567 }
0x1af7   :  { %v2303_v23 = vpop.eup %2302 }
0x1af8   :  { %1563 = vrot.lane.b32.xlu0 %v2303_v23, %s2375_s16 }
0x1b60   :  { %v1579_v28 = vpop.permute.xlu1 %1578 }
0x1b61   :  { %1581 = vst.msk [vmem:[#allocation5] sm:$0xff] %vm66_vm0, %v1579_v28 }
0x1b68   :  { %v1583_v44 = vld [vmem:[#allocation5] sm:$0xff] }
0x1b69   :  { %1667 = vrot.lane.b32.xlu1 %v1583_v44, %s2375_s16 }
0x1b6a   :  { %v1564_v29 = vpop.permute.xlu0 %1563 }
0x1b6b   :  { %v1566_v31 = vmul.f32 %v2301_v1, %v1564_v29 }
0x1b6d   :  { %v1570_v32 = vsel %vm684_vm9, %v1566_v31, %v1568_v25 }
0x1b6e   :  { %1573 = vrot.lane.b32.xlu0 %v1570_v32, %s2376_s18 }
0x1bdb   :  { %v1668_v53 = vpop.permute.xlu1 %1667 }
0x1be0   :  { %v1574_v33 = vpop.permute.xlu0 %1573 }
0x1be1   :  { %1576 = vst.msk [vmem:[#allocation4] sm:$0xff] %vm66_vm0, %v1574_v33 }
0x1be8   :  { %v1582_v35 = vld [vmem:[#allocation4] sm:$0xff] }
0x1be9   :  { %2110 = vmatmul.mubr.msk.f32.vlgmr.msra.gmra.mrb[12].mxu1 %vm66_vm0, %v1582_v35 }
0x1cbc   :  { %v1654_v38 = vpop.f32.mrb[12].mxu1 }
0x1cbd   :  { %v1658_v39 = vadd.f32 %v1654_v38, %v1086_v36  ;;  %v2111_v41 = vpop.f32.mrb[13].mxu1 }
0x1cbf   :  { %2304 = vtanh.f32 %v1658_v39  ;;  %v1874_v6 = vmul.f32 -1.442695, %v1658_v39 }
0x1cc1   :  { %2306 = vpow2.f32 %v1874_v6 }
0x1cc9   :  { %v2305_v43 = vpop.eup %2304 }
0x1cca   :  { %1672 = vrot.lane.b32.xlu0 %v2305_v43, %s2375_s16 }
0x1ccb   :  { %v2307_v47 = vpop.eup %2306 }
0x1ccc   :  { %v1662_v49 = vadd.f32 1.0, %v2307_v47 }
0x1cce   :  { %2308 = vrcp.f32 %v1662_v49 }
0x1cd8   :  { %v2309_v50 = vpop.eup %2308 }
0x1cd9   :  { %v1670_v54 = vmul.f32 %v2309_v50, %v1668_v53 }
0x1d3c   :  { %v1673_v63 = vpop.permute.xlu0 %1672 }
0x1d3d   :  { %v1675_v27 = vmul.f32 %v2309_v50, %v1673_v63 }
0x1d3f   :  { %1677 = vrot.lane.b32.xlu0 %v1675_v27, %s2375_s16 }
0x1d43   :  { %1687 = vrot.lane.b32.xlu0 %v1582_v35, %s2376_s18 }
0x1db1   :  { %v1678_v56 = vpop.permute.xlu0 %1677 }
0x1db2   :  { %v1680_v57 = vadd.f32 %v1678_v56, %v1670_v54 }
0x1db4   :  { %2310 = vtanh.f32 %v1680_v57  ;;  %v1691_v58 = vsel %vm813_vm11, %v1680_v57, %v1668_v53 }
0x1db5   :  { %1698 = vrot.lane.b32.xlu0 %v1691_v58, %s2377_s0  ;;  %v1688_v60 = vpop.permute.xlu0 %1687 }
0x1dbe   :  { %v2311_v59 = vpop.eup %2310 }
0x1dbf   :  { %1683 = vrot.lane.b32.xlu1 %v2311_v59, %s2375_s16 }
0x1e27   :  { %v1699_v61 = vpop.permute.xlu0 %1698 }
0x1e28   :  { %1701 = vst.msk [vmem:[#allocation5] sm:$0xff] %vm66_vm0, %v1699_v61 }
0x1e2f   :  { %v1703_v62 = vld [vmem:[#allocation5] sm:$0xff] }
0x1e30   :  { %1787 = vrot.lane.b32.xlu0 %v1703_v62, %s2375_s16 }
0x1e31   :  { %v1684_v9 = vpop.permute.xlu1 %1683 }
0x1e32   :  { %v1686_v48 = vmul.f32 %v2309_v50, %v1684_v9 }
0x1e34   :  { %v1690_v2 = vsel %vm813_vm11, %v1686_v48, %v1688_v60 }
0x1e35   :  { %1693 = vrot.lane.b32.xlu1 %v1690_v2, %s2376_s18 }
0x1ea2   :  { %v1788_v51 = vpop.permute.xlu0 %1787 }
0x1ea7   :  { %v1694_v45 = vpop.permute.xlu1 %1693 }
0x1ea8   :  { %1696 = vst.msk [vmem:[#allocation4] sm:$0xff] %vm66_vm0, %v1694_v45 }
0x1eaf   :  { %v1702_v3 = vld [vmem:[#allocation4] sm:$0xff] }
0x1eb0   :  { %2121 = vmatmul.mubr.msk.f32.vlgmr.msra.gmra.mrb[20].mxu0 %vm66_vm0, %v1702_v3 }
0x1f83   :  { %v1774_v5 = vpop.f32.mrb[20].mxu0 }
0x1f84   :  { %v1778_v14 = vadd.f32 %v1774_v5, %v1091_v4  ;;  %v2122_v7 = vpop.f32.mrb[21].mxu0 }
0x1f86   :  { %2312 = vtanh.f32 %v1778_v14  ;;  %v1876_v55 = vmul.f32 -1.442695, %v1778_v14 }
0x1f88   :  { %2314 = vpow2.f32 %v1876_v55 }
0x1f90   :  { %v2313_v30 = vpop.eup %2312 }
0x1f91   :  { %1792 = vrot.lane.b32.xlu1 %v2313_v30, %s2375_s16 }
0x1f92   :  { %v2315_v24 = vpop.eup %2314 }
0x1f93   :  { %v1782_v8 = vadd.f32 1.0, %v2315_v24 }
0x1f95   :  { %2316 = vrcp.f32 %v1782_v8 }
0x1f9f   :  { %v2317_v10 = vpop.eup %2316 }
0x1fa0   :  { %v1790_v52 = vmul.f32 %v2317_v10, %v1788_v51 }
0x2003   :  { %v1793_v11 = vpop.permute.xlu1 %1792 }
0x2004   :  { %v1795_v12 = vmul.f32 %v2317_v10, %v1793_v11 }
0x2006   :  { %1797 = vrot.lane.b32.xlu1 %v1795_v12, %s2375_s16 }
0x200a   :  { %1807 = vrot.lane.b32.xlu1 %v1702_v3, %s2376_s18 }
0x2078   :  { %v1798_v42 = vpop.permute.xlu1 %1797 }
0x2079   :  { %v1800_v13 = vadd.f32 %v1798_v42, %v1790_v52 }
0x207b   :  { %2318 = vtanh.f32 %v1800_v13  ;;  %v1811_v15 = vsel %vm942_vm13, %v1800_v13, %v1788_v51 }
0x207c   :  { %1818 = vrot.lane.b32.xlu1 %v1811_v15, %s2377_s0  ;;  %v1808_v16 = vpop.permute.xlu1 %1807 }
0x2085   :  { %v2319_v40 = vpop.eup %2318 }
0x2086   :  { %1803 = vrot.lane.b32.xlu0 %v2319_v40, %s2375_s16 }
0x20ee   :  { %v1819_v18 = vpop.permute.xlu1 %1818 }
0x20ef   :  { %1821 = vst.msk [vmem:[#allocation5] sm:$0xff] %vm66_vm0, %v1819_v18 }
0x20f8   :  { %v1804_v34 = vpop.permute.xlu0 %1803 }
0x20f9   :  { %v1806_v19 = vmul.f32 %v2317_v10, %v1804_v34 }
0x20fb   :  { %v1810_v1 = vsel %vm942_vm13, %v1806_v19, %v1808_v16 }
0x20fc   :  { %1813 = vrot.lane.b32.xlu0 %v1810_v1, %s2376_s18 }
0x216e   :  { %v1814_v20 = vpop.permute.xlu0 %1813 }
0x216f   :  { %1816 = vst.msk [vmem:[#allocation4] sm:$0xff] %vm66_vm0, %v1814_v20 }
0x2176   :  { %v1822_v0 = vld [vmem:[#allocation4] sm:$0xff] }
0x2177   :  { %1823 = vst.msk [vmem:[#allocation9] sm:$0xff] %vm66_vm0, %v1822_v0 }
0x2178   :  { %2353 = shalt.err (!%p2350_p12)
}
0x2179   :  { %s2354_s3 = scalar_lea.hbm %s2871_s8, 128 }
0x217a   :  { %p2355_p13 = scmp.ne.s32.totalorder %s2871_s8, %s2354_s3  ;;  %p2358_p0 = scmp.lt.u32.totalorder %s2354_s3, %s2871_s8 }
0x217c   :  { %p2360_p1 = pnand %p2358_p0, %p2355_p13 }
0x217e   :  { %2363 = shalt.err (!%p2360_p1)
}
0x217f   :  { %1833 = dma.vmem_to_hbm [thread:$0]  %s1831_s12, 128, %s2871_s8, [#allocation8]  }
0x2180   :  { %2366 = dma.done.wait [#allocation8], 128  }
0x2181   :  { %2367 = vsyncadd [#allocation8], 4294967168 }
0x2182   :  { %1837 = vsyncpa [#allocation7], 1 }
0x2183   :  { %1838 = vsyncpa [#allocation8], 1 }

</bundles_post_ra>
